<compile_context>
chip_gen: v7x
topology: tpu7x:2x2x1
jax: 0.10.0
libtpu: 0.0.40
codegen_flags: <defaults>
</compile_context>

<pallas_src>
import functools

import jax
import jax.numpy as jnp
from jax import lax
from jax.experimental import pallas as pl
from jax.experimental.pallas import tpu as pltpu

# deterministic "weights" from the module's __init__ (no checkpoint load)
_W0, _W1, _W2 = 0.05, 0.25, 0.4   # symmetric 5-tap gaussian [w0, w1, w2, w1, w0]
_EPS = 1e-3                       # CharbonnierLoss eps


# ---------------------------------------------------------------------------
# constant operator construction (wrapper-side, one-time)
# ---------------------------------------------------------------------------
def _conv_matrix(n):
    """n x n matrix C with (C @ v)[i] = sum_s k[s+2] * v[clip(i+s, 0, n-1)]."""
    taps = (_W0, _W1, _W2, _W1, _W0)
    idx = jnp.arange(n)
    c = jnp.zeros((n, n), jnp.float32)
    for s, wgt in zip(range(-2, 3), taps):
        c = c.at[idx, jnp.clip(idx + s, 0, n - 1)].add(jnp.float32(wgt))
    return c


def _laplacian_operators(h, w):
    """lap(d) = d - A_H @ d @ A_W  (separable conv + even mask as MXU constants)."""
    ch = _conv_matrix(h)
    cw = _conv_matrix(w)
    er = (jnp.arange(h) % 2 == 0).astype(jnp.float32)   # rows kept by [::2]
    ec = (jnp.arange(w) % 2 == 0).astype(jnp.float32)   # cols kept by [::2]
    a_h = ch @ (er[:, None] * ch)                        # C_H @ diag(er) @ C_H
    a_w = 4.0 * (cw.T * ec[None, :]) @ cw.T              # 4 * C_W^T @ diag(ec) @ C_W^T
    return a_h, a_w


# ---------------------------------------------------------------------------
# Pallas kernel: NB slabs per grid step, laplacian of (x - y) via two constant
# matmuls on the MXU, per-lane (8,128) Charbonnier partial sums.
# ---------------------------------------------------------------------------
def _edge_loss_kernel(ah_ref, aw_ref, x_ref, y_ref, out_ref, *, n_valid, mask_tail):
    nb, h, w = x_ref.shape
    lane_sums = (h % 8 == 0) and (w % 128 == 0)
    eps2 = jnp.float32(_EPS * _EPS)
    a_h = ah_ref[...]                 # (h, h) VMEM-resident constant
    a_w = aw_ref[...]                 # (w, w) VMEM-resident constant
    base = pl.program_id(0) * nb

    def body(k, acc):
        # linearity: laplacian(x) - laplacian(y) == laplacian(x - y)
        d = x_ref[k].astype(jnp.float32) - y_ref[k].astype(jnp.float32)
        t = jnp.dot(a_h, d, preferred_element_type=jnp.float32)
        lap = d - jnp.dot(t, a_w, preferred_element_type=jnp.float32)
        v = jnp.sqrt(lap * lap + eps2)
        if lane_sums:
            # layout-preserving reshape -> per-lane partial sums (VPU adds only)
            part = v.reshape(h // 8, 8, w // 128, 128).sum(axis=(0, 2))
        else:
            # TODO(synk): lane-aligned partial reduction when h%8 or w%128 != 0
            ri = lax.broadcasted_iota(jnp.int32, (8, 128), 0)
            ci = lax.broadcasted_iota(jnp.int32, (8, 128), 1)
            part = jnp.where((ri == 0) & (ci == 0), jnp.sum(v), jnp.float32(0.0))
        if mask_tail:
            part = jnp.where(base + k < n_valid, part, jnp.zeros_like(part))
        return acc + part

    acc = lax.fori_loop(0, nb, body, jnp.zeros((8, 128), jnp.float32), unroll=True)
    out_ref[0] = acc                  # lane-dense (8,128) partial-sum block


def edge_loss(x, y):
    """EdgeLoss.forward(x, y) for NCHW float inputs -> scalar f32 loss."""
    assert x.shape == y.shape
    b, c, h, w = x.shape
    n = b * c
    xf = x.reshape(n, h, w)           # keep native dtype; upcast in-kernel
    yf = y.reshape(n, h, w)

    # per-generation VMEM budget (v5e/v6e: 128 MiB physical, v7x: 64 MiB)
    try:
        vmem_cap = int(pltpu.get_tpu_info().vmem_capacity_bytes)
    except Exception:
        vmem_cap = 64 * 1024 * 1024
    vmem_limit = min(96 * 1024 * 1024, (vmem_cap * 3) // 4)

    # Slabs per grid step: fit the per-block budget, keep >= 2 grid steps when
    # n >= 2 (megacore sharding + i+1 prefetch), cap at 8.  Non-divisor nb is
    # handled by zero-padding + in-kernel tail guard.
    slab_bytes = h * w * 4
    budget = max(2 * 1024 * 1024, vmem_limit // 12)
    nb = max(1, min(8, budget // slab_bytes, (n + 1) // 2, n))
    num_blocks = -(-n // nb)
    n_pad = num_blocks * nb
    if n_pad != n:
        pad = ((0, n_pad - n), (0, 0), (0, 0))
        xf = jnp.pad(xf, pad)
        yf = jnp.pad(yf, pad)
    # TODO(synk): H-strip tiling for slabs whose f32 block exceeds `budget`.

    a_h, a_w = _laplacian_operators(h, w)
    kernel = functools.partial(_edge_loss_kernel, n_valid=n, mask_tail=(n_pad != n))

    partial = pl.pallas_call(
        kernel,
        out_shape=jax.ShapeDtypeStruct((num_blocks, 8, 128), jnp.float32),
        grid_spec=pltpu.PrefetchScalarGridSpec(
            num_scalar_prefetch=0,
            grid=(num_blocks,),
            in_specs=[
                pl.BlockSpec((h, h), lambda i: (0, 0)),        # A_H, resident
                pl.BlockSpec((w, w), lambda i: (0, 0)),        # A_W, resident
                pl.BlockSpec((nb, h, w), lambda i: (i, 0, 0)),
                pl.BlockSpec((nb, h, w), lambda i: (i, 0, 0)),
            ],
            out_specs=pl.BlockSpec((1, 8, 128), lambda i: (i, 0, 0)),
        ),
        compiler_params=pltpu.CompilerParams(
            dimension_semantics=("parallel",),     # independent per-block partials
            vmem_limit_bytes=int(vmem_limit),
        ),
    )(a_h, a_w, xf, yf)

    # per-block, per-lane partial sums -> mean (reduced in the wrapper)
    return jnp.sum(partial) / jnp.float32(n * h * w)


# ---------------------------------------------------------------------------
# pure-JAX reference (mirrors the PyTorch module) for correctness check
# ---------------------------------------------------------------------------
def _ref_conv_gauss(img, kern):
    img_p = jnp.pad(img, ((0, 0), (0, 0), (2, 2), (2, 2)), mode="edge")
    return lax.conv_general_dilated(
        img_p, kern, window_strides=(1, 1), padding="VALID",
        dimension_numbers=("NCHW", "OIHW", "NCHW"),
        feature_group_count=img.shape[1])


def edge_loss_ref(x, y):
    k1 = jnp.asarray([_W0, _W1, _W2, _W1, _W0], jnp.float32)
    k2 = jnp.outer(k1, k1)
    c = x.shape[1]
    kern = jnp.broadcast_to(k2, (c, 1, 5, 5))

    def lap(img):
        f = _ref_conv_gauss(img, kern)
        nf = jnp.zeros_like(f).at[:, :, ::2, ::2].set(f[:, :, ::2, ::2] * 4.0)
        return img - _ref_conv_gauss(nf, kern)

    d = lap(x) - lap(y)
    return jnp.mean(jnp.sqrt(d * d + _EPS * _EPS))


if __name__ == "__main__":
    key = jax.random.PRNGKey(0)
    kx, ky = jax.random.split(key)
    # module hard-codes 3 channels (kernel repeated 3x); lane/sublane-aligned spatial
    x = jax.random.normal(kx, (2, 3, 64, 128), jnp.float32)
    y = jax.random.normal(ky, (2, 3, 64, 128), jnp.float32)

    out = jax.block_until_ready(edge_loss(x, y))
    ref = jax.block_until_ready(edge_loss_ref(x, y))
    assert jnp.allclose(out, ref, rtol=1e-4, atol=1e-5), (out, ref)

    # tail-guard path: n = b*c = 3 -> nb = 2, one zero-padded (masked) slab
    out2 = jax.block_until_ready(edge_loss(x[:1], y[:1]))
    ref2 = jax.block_until_ready(edge_loss_ref(x[:1], y[:1]))
    assert jnp.allclose(out2, ref2, rtol=1e-4, atol=1e-5), (out2, ref2)

    print("KERNEL_OK")
</pallas_src>

<mosaic_0001>
module attributes {stable_mosaic.version = 11 : i64} {
  func.func @_edge_loss_kernel(%arg0: i32, %arg1: memref<64x64xf32, #tpu.memory_space<vmem>>, %arg2: memref<128x128xf32, #tpu.memory_space<vmem>>, %arg3: memref<3x64x128xf32, #tpu.memory_space<vmem>>, %arg4: memref<3x64x128xf32, #tpu.memory_space<vmem>>, %arg5: memref<1x8x128xf32, #tpu.memory_space<vmem>>) attributes {dimension_semantics = [#tpu.dimension_semantics<parallel>], iteration_bounds = array<i64: 2>, scalar_prefetch = 0 : i64, scratch_operands = 0 : i64, tpu.core_type = #tpu.core_type<tc>, window_params = [{pipeline_mode = #tpu.pipeline_mode<synchronous>, transform_indices = @transform_0, window_bounds = array<i64: 64, 64>}, {pipeline_mode = #tpu.pipeline_mode<synchronous>, transform_indices = @transform_1, window_bounds = array<i64: 128, 128>}, {transform_indices = @transform_2, window_bounds = array<i64: 3, 64, 128>}, {transform_indices = @transform_3, window_bounds = array<i64: 3, 64, 128>}, {transform_indices = @transform_4, window_bounds = array<i64: 1, 8, 128>}]} {
    %c0 = arith.constant 0 : index
    %c0_0 = arith.constant 0 : index
    %0 = vector.load %arg1[%c0, %c0_0] : memref<64x64xf32, #tpu.memory_space<vmem>>, vector<64x64xf32>
    %c0_1 = arith.constant 0 : index
    %c0_2 = arith.constant 0 : index
    %1 = vector.load %arg2[%c0_1, %c0_2] : memref<128x128xf32, #tpu.memory_space<vmem>>, vector<128x128xf32>
    %cst = arith.constant 0.000000e+00 : f32
    %2 = vector.broadcast %cst : f32 to vector<8x128xf32>
    %cst_3 = arith.constant 9.99999997E-7 : f32
    %c0_i32 = arith.constant 0 : i32
    %3 = arith.index_cast %c0_i32 : i32 to index
    %c0_4 = arith.constant 0 : index
    %c0_5 = arith.constant 0 : index
    %4 = vector.load %arg3[%3, %c0_4, %c0_5] : memref<3x64x128xf32, #tpu.memory_space<vmem>>, vector<1x64x128xf32>
    %5 = vector.shape_cast %4 : vector<1x64x128xf32> to vector<64x128xf32>
    %6 = arith.index_cast %c0_i32 : i32 to index
    %c0_6 = arith.constant 0 : index
    %c0_7 = arith.constant 0 : index
    %7 = vector.load %arg4[%6, %c0_6, %c0_7] : memref<3x64x128xf32, #tpu.memory_space<vmem>>, vector<1x64x128xf32>
    %8 = vector.shape_cast %7 : vector<1x64x128xf32> to vector<64x128xf32>
    %9 = arith.subf %5, %8 : vector<64x128xf32>
    %cst_8 = arith.constant dense<0.000000e+00> : vector<64x128xf32>
    %10 = tpu.matmul %0, %9, %cst_8 {dimension_numbers = #tpu.dot_dimension_numbers<[1], [0], [0], [1], [0, 0, 1, 1], [], []>} : vector<64x64xf32>, vector<64x128xf32>, vector<64x128xf32> -> vector<64x128xf32>
    %cst_9 = arith.constant dense<0.000000e+00> : vector<64x128xf32>
    %11 = tpu.matmul %10, %1, %cst_9 {dimension_numbers = #tpu.dot_dimension_numbers<[1], [0], [0], [1], [0, 0, 1, 1], [], []>} : vector<64x128xf32>, vector<128x128xf32>, vector<64x128xf32> -> vector<64x128xf32>
    %12 = arith.subf %9, %11 : vector<64x128xf32>
    %13 = arith.mulf %12, %12 : vector<64x128xf32>
    %14 = vector.broadcast %cst_3 : f32 to vector<64x128xf32>
    %15 = arith.addf %13, %14 : vector<64x128xf32>
    %16 = math.sqrt %15 : vector<64x128xf32>
    %17 = vector.shape_cast %16 : vector<64x128xf32> to vector<8x8x1x128xf32>
    %cst_10 = arith.constant dense<0.000000e+00> : vector<8x128xf32>
    %18 = vector.multi_reduction <add>, %17, %cst_10 [0, 2] : vector<8x8x1x128xf32> to vector<8x128xf32>
    %19 = arith.addf %2, %18 : vector<8x128xf32>
    %c1_i32 = arith.constant 1 : i32
    %20 = arith.index_cast %c1_i32 : i32 to index
    %c0_11 = arith.constant 0 : index
    %c0_12 = arith.constant 0 : index
    %21 = vector.load %arg3[%20, %c0_11, %c0_12] : memref<3x64x128xf32, #tpu.memory_space<vmem>>, vector<1x64x128xf32>
    %22 = vector.shape_cast %21 : vector<1x64x128xf32> to vector<64x128xf32>
    %23 = arith.index_cast %c1_i32 : i32 to index
    %c0_13 = arith.constant 0 : index
    %c0_14 = arith.constant 0 : index
    %24 = vector.load %arg4[%23, %c0_13, %c0_14] : memref<3x64x128xf32, #tpu.memory_space<vmem>>, vector<1x64x128xf32>
    %25 = vector.shape_cast %24 : vector<1x64x128xf32> to vector<64x128xf32>
    %26 = arith.subf %22, %25 : vector<64x128xf32>
    %cst_15 = arith.constant dense<0.000000e+00> : vector<64x128xf32>
    %27 = tpu.matmul %0, %26, %cst_15 {dimension_numbers = #tpu.dot_dimension_numbers<[1], [0], [0], [1], [0, 0, 1, 1], [], []>} : vector<64x64xf32>, vector<64x128xf32>, vector<64x128xf32> -> vector<64x128xf32>
    %cst_16 = arith.constant dense<0.000000e+00> : vector<64x128xf32>
    %28 = tpu.matmul %27, %1, %cst_16 {dimension_numbers = #tpu.dot_dimension_numbers<[1], [0], [0], [1], [0, 0, 1, 1], [], []>} : vector<64x128xf32>, vector<128x128xf32>, vector<64x128xf32> -> vector<64x128xf32>
    %29 = arith.subf %26, %28 : vector<64x128xf32>
    %30 = arith.mulf %29, %29 : vector<64x128xf32>
    %31 = vector.broadcast %cst_3 : f32 to vector<64x128xf32>
    %32 = arith.addf %30, %31 : vector<64x128xf32>
    %33 = math.sqrt %32 : vector<64x128xf32>
    %34 = vector.shape_cast %33 : vector<64x128xf32> to vector<8x8x1x128xf32>
    %cst_17 = arith.constant dense<0.000000e+00> : vector<8x128xf32>
    %35 = vector.multi_reduction <add>, %34, %cst_17 [0, 2] : vector<8x8x1x128xf32> to vector<8x128xf32>
    %36 = arith.addf %19, %35 : vector<8x128xf32>
    %c2_i32 = arith.constant 2 : i32
    %37 = arith.index_cast %c2_i32 : i32 to index
    %c0_18 = arith.constant 0 : index
    %c0_19 = arith.constant 0 : index
    %38 = vector.load %arg3[%37, %c0_18, %c0_19] : memref<3x64x128xf32, #tpu.memory_space<vmem>>, vector<1x64x128xf32>
    %39 = vector.shape_cast %38 : vector<1x64x128xf32> to vector<64x128xf32>
    %40 = arith.index_cast %c2_i32 : i32 to index
    %c0_20 = arith.constant 0 : index
    %c0_21 = arith.constant 0 : index
    %41 = vector.load %arg4[%40, %c0_20, %c0_21] : memref<3x64x128xf32, #tpu.memory_space<vmem>>, vector<1x64x128xf32>
    %42 = vector.shape_cast %41 : vector<1x64x128xf32> to vector<64x128xf32>
    %43 = arith.subf %39, %42 : vector<64x128xf32>
    %cst_22 = arith.constant dense<0.000000e+00> : vector<64x128xf32>
    %44 = tpu.matmul %0, %43, %cst_22 {dimension_numbers = #tpu.dot_dimension_numbers<[1], [0], [0], [1], [0, 0, 1, 1], [], []>} : vector<64x64xf32>, vector<64x128xf32>, vector<64x128xf32> -> vector<64x128xf32>
    %cst_23 = arith.constant dense<0.000000e+00> : vector<64x128xf32>
    %45 = tpu.matmul %44, %1, %cst_23 {dimension_numbers = #tpu.dot_dimension_numbers<[1], [0], [0], [1], [0, 0, 1, 1], [], []>} : vector<64x128xf32>, vector<128x128xf32>, vector<64x128xf32> -> vector<64x128xf32>
    %46 = arith.subf %43, %45 : vector<64x128xf32>
    %47 = arith.mulf %46, %46 : vector<64x128xf32>
    %48 = vector.broadcast %cst_3 : f32 to vector<64x128xf32>
    %49 = arith.addf %47, %48 : vector<64x128xf32>
    %50 = math.sqrt %49 : vector<64x128xf32>
    %51 = vector.shape_cast %50 : vector<64x128xf32> to vector<8x8x1x128xf32>
    %cst_24 = arith.constant dense<0.000000e+00> : vector<8x128xf32>
    %52 = vector.multi_reduction <add>, %51, %cst_24 [0, 2] : vector<8x8x1x128xf32> to vector<8x128xf32>
    %53 = arith.addf %36, %52 : vector<8x128xf32>
    %c3_i32 = arith.constant 3 : i32
    %c0_25 = arith.constant 0 : index
    %c0_26 = arith.constant 0 : index
    %c0_27 = arith.constant 0 : index
    %54 = vector.load %arg5[%c0_25, %c0_26, %c0_27] : memref<1x8x128xf32, #tpu.memory_space<vmem>>, vector<1x8x128xf32>
    %55 = vector.shape_cast %54 : vector<1x8x128xf32> to vector<8x128xf32>
    %56 = vector.shape_cast %53 : vector<8x128xf32> to vector<1x8x128xf32>
    tpu.vector_store %arg5[%c0_25, %c0_26, %c0_27], %56 {strides = array<i32>} : memref<1x8x128xf32, #tpu.memory_space<vmem>>, vector<1x8x128xf32>,
    return
  }
  func.func @transform_0(%arg0: i32) -> (i32, i32) {
    %c0_i32 = arith.constant 0 : i32
    %c0_i32_0 = arith.constant 0 : i32
    %c0_i32_1 = arith.constant 0 : i32
    return %c0_i32, %c0_i32_0 : i32, i32
  }
  func.func @transform_1(%arg0: i32) -> (i32, i32) {
    %c0_i32 = arith.constant 0 : i32
    %c0_i32_0 = arith.constant 0 : i32
    %c0_i32_1 = arith.constant 0 : i32
    return %c0_i32, %c0_i32_0 : i32, i32
  }
  func.func @transform_2(%arg0: i32) -> (i32, i32, i32) {
    %c0_i32 = arith.constant 0 : i32
    %c0_i32_0 = arith.constant 0 : i32
    %c0_i32_1 = arith.constant 0 : i32
    return %arg0, %c0_i32, %c0_i32_0 : i32, i32, i32
  }
  func.func @transform_3(%arg0: i32) -> (i32, i32, i32) {
    %c0_i32 = arith.constant 0 : i32
    %c0_i32_0 = arith.constant 0 : i32
    %c0_i32_1 = arith.constant 0 : i32
    return %arg0, %c0_i32, %c0_i32_0 : i32, i32, i32
  }
  func.func @transform_4(%arg0: i32) -> (i32, i32, i32) {
    %c0_i32 = arith.constant 0 : i32
    %c0_i32_0 = arith.constant 0 : i32
    %c0_i32_1 = arith.constant 0 : i32
    return %arg0, %c0_i32, %c0_i32_0 : i32, i32, i32
  }
}

</mosaic_0001>

<bundles_post_ra>
// kernel: tpu_custom_call.1
= control target key start
LH: loop header
LB: loop body
LE: loop exit
PB: predicated region body
PF: predicated region fallthrough
CT: control target
= control target key end

     0   :  { %s5850_s0 = inlined_call_operand.hbm [shape: f32[64,64], index: 0, kind: input, shape index: {}]   ;;  %s5851_s1 = inlined_call_operand.hbm [shape: f32[128,128], index: 1, kind: input, shape index: {}]   ;;  %s5852_s2 = inlined_call_operand.hbm [shape: f32[6,64,128], index: 2, kind: input, shape index: {}]   ;;  %s5853_s3 = inlined_call_operand.hbm [shape: f32[6,64,128], index: 3, kind: input, shape index: {}]   ;;  %s5854_s4 = inlined_call_operand.hbm [shape: f32[2,8,128], index: 4, kind: output, shape index: {}]  }
   0x1   :  { %5869 = sst [smem:[#allocation20_spill]] %s5850_s0 }
   0x2   :  { %9 = vsyncpa [#allocation3], 0 }
   0x3   :  { %10 = vsyncpa [#allocation6], 0 }
   0x4   :  { %11 = vsyncpa [#allocation4], 0 }
   0x5   :  { %13 = vsyncpa [#allocation4 + $0x1], 0  ;;  %s4257_s15 = smov 0   ;;  %s4259_s16 = smov 0  }
   0x6   :  { %s4261_s17 = smov 0   ;;  %s4263_s18 = smov 0  }
   0x7 LB: > { %s4278_s19 = sadd.s32 4294967295, %s4222_s18   ;;  %s3347_s20 = sadd.s32 4294967294, %s4222_s18   ;;  %s4222_s18 = sphi %s4263_s18, %s5930_s18   ;;  %s4218_s17 = sphi %s4261_s17, %s5929_s17   ;;  %s4214_s16 = sphi %s4259_s16, %s5928_s16   ;;  %s4210_s15 = sphi %s4257_s15, %s5927_s15  }
   0x8   : > { %s4282_s21 = sadd.s32 1, %s4222_s18   ;;  %s68_s22 = sadd.s32 1, %s4218_s17 }
   0x9   : > { %s65_s23 = ssub.s32 %s4222_s18, %s4282_s21  ;;  %p75_p0 = scmp.ne.s32.totalorder %s4218_s17, %s4214_s16 }
   0xa   : > { %p66_p1 = scmp.eq.s32.totalorder %s65_s23, 0  ;;  %p76_p2 = scmp.eq.s32.totalorder %s4222_s18, 0 }
   0xb   : > { %p81_p3 = scmp.ne.s32.totalorder %s4214_s16, %s4210_s15  ;;  %p5855_p4 = scmp.eq.s32.totalorder %s4278_s19, 0 }
   0xc   : > { %s4294_s24 = scalar_select %p66_p1, %s4218_s17, %s68_s22  }
   0xd   : > { %p4296_p5 = por %p76_p2, %p75_p0  ;;  %p4302_p6 = por %p5855_p4, %p81_p3 }
   0xe   : > { %p131_p7 = scmp.eq.s32.totalorder %s4278_s19, 1  ;;  %p137_p8 = scmp.eq.s32.totalorder %s3347_s20, 1 }
   0xf   : > { %s5870_s25 = scalar_select %p4296_p5, 1, 0 }
  0x10   : > { %s5871_s26 = scalar_select %p4302_p6, 1, 0 }
  0x11   : > { %p3348_p9 = scmp.ge.s32.totalorder %s4222_s18, 1  ;;  %p144_p10 = scmp.lt.s32.totalorder %s4222_s18, 3 }
  0x12   : > { %p4309_p11 = por %p131_p7, %p75_p0  ;;  %p4313_p12 = por %p137_p8, %p81_p3 }
  0x13   : > { %p4317_p13 = pnand %p3348_p9, %p144_p10  ;;  %s4224_s30 = smov [#allocation2]  }
  0x14   : > { %s5872_s27 = scalar_select %p4309_p11, 1, 0 }
  0x15   : > { %s5873_s28 = scalar_select %p4313_p12, 1, 0 }
  0x16   : > { %s5874_s29 = scalar_select %p4317_p13, 1, 0 }
  0x17   : > { %p3923_p1 = pneg %p4317_p13  ;;  %s156_s5 = sshll.u32 %s4224_s30, 4  ;;  %s157_s5 = int_to_ptr.vmem [resolvable:$true] %s156_s5 }
  0x18   : > { %s5876_s0 = sld [smem:[#allocation20_spill]] }
  0x19   : > { %p4325_p2 = pnand %p3923_p1, %p5855_p4 }
  0x1b   : > { %p5862_p8 = pneg %p4325_p2 }
  0x1e   : > { %s4032_s10 = scalar_lea.hbm %s5876_s0, 1024 }
  0x1f   : > { %p4033_p7 = scmp.ne.s32.totalorder %s5876_s0, %s4032_s10  ;;  %p4039_p1 = scmp.lt.u32.totalorder %s4032_s10, %s5876_s0 }
  0x21   : > { %p4035_p9 = pnand %p5862_p8, %p4033_p7 }
  0x23   : > { %p4036_p10 = pneg %p4035_p9 }
  0x25   : > { %p4041_p0 = pnand %p4039_p1, %p4036_p10 }
  0x27   : > { %4044 = shalt.err (!%p4041_p0)
}
  0x28   : > { %s4045_s20 = scalar_lea.vmem %s157_s5, 1024  ;;  %p4053_p11 = scmp.lt.s32.totalorder %s157_s5, %s157_s5 }
  0x29   : > { %p4046_p4 = scmp.ne.s32.totalorder %s157_s5, %s4045_s20  ;;  %p4054_p6 = scmp.lt.s32.totalorder %s4045_s20, %s4045_s20 }
  0x2b   : > { %p4048_p3 = pnand %p4046_p4, %p5862_p8  ;;  %p4055_p13 = por %p4054_p6, %p4053_p11 }
  0x2d   : > { %p4049_p12 = pneg %p4048_p3 }
  0x2f   : > { %p4056_p5 = pnand %p4055_p13, %p4049_p12 }
  0x31   : > { %4059 = shalt.err (!%p4056_p5)
}
  0x32   : > { %s5860_s22 = smov 128   ;;  %s4226_s23 = smov 8  }
  0x33   : > { %3926 = dma.hbm_to_vmem [thread:$0]  (!%p4325_p2), %s5876_s0, 1024, %s157_s5, [#allocation3], %s5860_s22, %s5860_s22, %s4226_s23  }
  0x34   : > { %p5877_p4 = scmp.ne.s32.totalorder %s5870_s25, 0  ;;  %p5878_p6 = scmp.lt.s32.totalorder %s4222_s18, 2 }
  0x35   : > { %s185_s10 = sand.u32 1, %s4218_s17   ;;  %s5859_s12 = smul.u32 3072, %s4222_s18 }
  0x36   : > { %p4361_p5 = pnand %p5878_p6, %p5877_p4  ;;  %s4366_s11 = smul.u32 192, %s185_s10 }
  0x37   : > { %s4227_s13 = smov [#allocation5]   ;;  %s4374_s5 = scalar_lea.hbm %s5852_s2, %s5859_s12 }
  0x38   : > { %s169_s14 = sshll.u32 %s4227_s13, 4  ;;  %s187_s25 = scalar_lea.vmem [#allocation7], %s4366_s11  ;;  %s4379_s14 = int_to_ptr.vmem [resolvable:$true] %s169_s14 }
  0x39   : > { %s195_s30 = sshll.u32 %s187_s25, 4  ;;  %s5880_s8 = sand.u32 1, %s4222_s18   ;;  %s4377_s30 = int_to_ptr.vmem [resolvable:$true] %s195_s30 }
  0x3a   : > { %s4383_s10 = scalar_lea.sflag [#allocation3], %s5880_s8  ;;  %s4060_s13 = scalar_lea.hbm %s4374_s5, 3072 }
  0x3b   : > { %p4061_p11 = scmp.ne.s32.totalorder %s4374_s5, %s4060_s13  ;;  %p4062_p12 = pneg %p4361_p5 }
  0x3c   : > { %s4065_s12 = scalar_lea.hbm %s5852_s2, 6144  ;;  %p4066_p3 = scmp.lt.u32.totalorder %s4374_s5, %s5852_s2 }
  0x3d   : > { %p4063_p13 = pnand %p4062_p12, %p4061_p11  ;;  %p4067_p7 = scmp.lt.u32.totalorder %s4065_s12, %s4060_s13 }
  0x3e   : > { %p4069_p10 = scmp.lt.u32.totalorder %s4060_s13, %s4374_s5 }
  0x3f   : > { %p4064_p0 = pneg %p4063_p13  ;;  %p4068_p9 = por %p4067_p7, %p4066_p3 }
  0x41   : > { %p4070_p1 = por %p4069_p10, %p4068_p9 }
  0x43   : > { %p4071_p4 = pnand %p4070_p1, %p4064_p0 }
  0x45   : > { %4074 = shalt.err (!%p4071_p4)
}
  0x46   : > { %s4075_s8 = scalar_lea.vmem %s4377_s30, 3072  ;;  %s4228_s7 = smov [#allocation7]  }
  0x47   : > { %p4076_p6 = scmp.ne.s32.totalorder %s4377_s30, %s4075_s8  ;;  %s4080_s20 = sshll.u32 %s4228_s7, 4  ;;  %s4081_s20 = int_to_ptr.vmem [resolvable:$false] %s4080_s20 }
  0x48   : > { %s4082_s22 = scalar_lea.vmem %s4081_s20, 6144  ;;  %p4083_p8 = scmp.lt.s32.totalorder %s4377_s30, %s4081_s20 }
  0x49   : > { %p4078_p11 = pnand %p4076_p6, %p4062_p12  ;;  %p4084_p3 = scmp.lt.s32.totalorder %s4082_s22, %s4075_s8 }
  0x4b   : > { %p4079_p13 = pneg %p4078_p11  ;;  %p4085_p7 = por %p4084_p3, %p4083_p8 }
  0x4d   : > { %p4086_p9 = pnand %p4085_p7, %p4079_p13 }
  0x4f   : > { %4089 = shalt.err (!%p4086_p9)
}
  0x50   : > { %s5881_s12 = smov 128   ;;  %s4090_s7 = scalar_lea.hbm %s5851_s1, 2048 }
  0x51   : > { %3933 = dma.hbm_to_vmem [thread:$0]  (!%p4361_p5), %s4374_s5, 3072, %s4377_s30, %s4383_s10, %s5881_s12, %s5881_s12, %s4226_s23  }
  0x52   : > { %p4091_p8 = scmp.ne.s32.totalorder %s5851_s1, %s4090_s7  ;;  %p5882_p0 = pneg %p4325_p2 }
  0x53   : > { %p4097_p4 = scmp.lt.u32.totalorder %s4090_s7, %s5851_s1 }
  0x54   : > { %p4093_p10 = pnand %p4091_p8, %p5882_p0 }
  0x56   : > { %p4094_p1 = pneg %p4093_p10 }
  0x58   : > { %p4099_p6 = pnand %p4097_p4, %p4094_p1 }
  0x5a   : > { %4102 = shalt.err (!%p4099_p6)
}
  0x5b   : > { %s4103_s5 = scalar_lea.vmem %s4379_s14, 2048  ;;  %p5883_p13 = pmov %p5882_p0 }
  0x5c   : > { %p4104_p11 = scmp.ne.s32.totalorder %s4379_s14, %s4103_s5  ;;  %p4111_p9 = scmp.lt.s32.totalorder %s4379_s14, %s4379_s14 }
  0x5d   : > { %p4112_p8 = scmp.lt.s32.totalorder %s4103_s5, %s4103_s5 }
  0x5e   : > { %p4106_p3 = pnand %p4104_p11, %p5883_p13 }
  0x5f   : > { %p4113_p0 = por %p4112_p8, %p4111_p9 }
  0x60   : > { %p4107_p7 = pneg %p4106_p3 }
  0x62   : > { %p4114_p10 = pnand %p4113_p0, %p4107_p7 }
  0x64   : > { %4117 = shalt.err (!%p4114_p10)
}
  0x65   : > { %3929 = dma.hbm_to_vmem [thread:$0]  (!%p4325_p2), %s5851_s1, 2048, %s4379_s14, [#allocation6], %s5881_s12, %s5881_s12, %s4226_s23  }
  0x66   : > { %s5884_s13 = smul.u32 3072, %s4222_s18  ;;  %s209_s6 = scalar_lea.vmem [#allocation8], %s4366_s11 }
  0x67   : > { %s217_s8 = sshll.u32 %s209_s6, 4  ;;  %s4123_s0 = scalar_lea.hbm %s5853_s3, 6144  ;;  %s4450_s8 = int_to_ptr.vmem [resolvable:$true] %s217_s8 }
  0x68   : > { %s4447_s20 = scalar_lea.hbm %s5853_s3, %s5884_s13 }
  0x69   : > { %s4118_s22 = scalar_lea.hbm %s4447_s20, 3072  ;;  %p4124_p6 = scmp.lt.u32.totalorder %s4447_s20, %s5853_s3 }
  0x6a   : > { %p4119_p1 = scmp.ne.s32.totalorder %s4447_s20, %s4118_s22  ;;  %p4125_p11 = scmp.lt.u32.totalorder %s4123_s0, %s4118_s22 }
  0x6b   : > { %p4127_p3 = scmp.lt.u32.totalorder %s4118_s22, %s4447_s20 }
  0x6c   : > { %p4121_p4 = pnand %p4119_p1, %p4062_p12  ;;  %p4126_p13 = por %p4125_p11, %p4124_p6 }
  0x6e   : > { %p4122_p2 = pneg %p4121_p4  ;;  %p4128_p7 = por %p4127_p3, %p4126_p13 }
  0x70   : > { %p4129_p9 = pnand %p4128_p7, %p4122_p2 }
  0x72   : > { %4132 = shalt.err (!%p4129_p9)
}
  0x73   : > { %s4133_s11 = scalar_lea.vmem %s4450_s8, 3072  ;;  %s4229_s25 = smov [#allocation8]  }
  0x74   : > { %p4134_p8 = scmp.ne.s32.totalorder %s4450_s8, %s4133_s11  ;;  %s4138_s7 = sshll.u32 %s4229_s25, 4  ;;  %s4139_s7 = int_to_ptr.vmem [resolvable:$false] %s4138_s7 }
  0x75   : > { %s4140_s6 = scalar_lea.vmem %s4139_s7, 6144  ;;  %p4141_p1 = scmp.lt.s32.totalorder %s4450_s8, %s4139_s7 }
  0x76   : > { %p4136_p0 = pnand %p4134_p8, %p4062_p12  ;;  %p4142_p4 = scmp.lt.s32.totalorder %s4140_s6, %s4133_s11 }
  0x78   : > { %p4137_p10 = pneg %p4136_p0  ;;  %p4143_p6 = por %p4142_p4, %p4141_p1 }
  0x7a   : > { %p4144_p11 = pnand %p4143_p6, %p4137_p10 }
  0x7c   : > { %4147 = shalt.err (!%p4144_p11)
}
  0x7d   : > { %3936 = dma.hbm_to_vmem [thread:$0]  (!%p4361_p5), %s4447_s20, 3072, %s4450_s8, %s4383_s10, %s5881_s12, %s5881_s12, %s4226_s23  }
  0x7e   : > { %p5885_p12 = scmp.ne.s32.totalorder %s5874_s29, 0 }
  0x80   : > { %229 = sbr.rel (%p5885_p12) target bundleno = 947 (0x3b3), region = 36 }
  0x87   : > { %p5886_p2 = scmp.eq.s32.totalorder %s4278_s19, 0 }
  0x89   : > { %4193 = dma.done.wait (%p5886_p2), [#allocation3], 1024   ;;  %p5887_p13 = pmov %p5886_p2 }
  0x8a   : > { %p5888_p3 = pmov %p5886_p2 }
  0x8b   : > { %4195 = vsyncadd (%p5887_p13), [#allocation3], 4294966272 }
  0x8c   : > { %4197 = dma.done.wait (%p5888_p3), [#allocation6], 2048   ;;  %p5889_p7 = pmov %p5886_p2 }
  0x8d   : > { %s239_s9 = sand.u32 1, %s4278_s19   ;;  %s4491_s23 = sand.u32 1, %s4214_s16  }
  0x8e   : > { %4199 = vsyncadd (%p5889_p7), [#allocation6], 4294965248  ;;  %s3908_s29 = smul.u32 192, %s4491_s23  ;;  %s240_s10 = scalar_lea.sflag [#allocation3], %s239_s9 }
  0x8f   : > { %p5890_p5 = scmp.ne.s32.totalorder %s5871_s26, 0 }
  0x90   : > { %s4494_s12 = scalar_lea.vmem [#allocation7], %s3908_s29 }
  0x91   : > { %4201 = dma.done.wait (%p5890_p5), %s240_s10, 6144  }
  0x92   : > { %4203 = vsyncadd (%p5890_p5), %s240_s10, 4294961152  ;;  %v308_v0 = vld [vmem:[%s4494_s12] sm:$0xff]  ;;  %v309_v1 = vld [vmem:[%s4494_s12 + $0x8] sm:$0xff]  ;;  %s4502_s20 = scalar_lea.vmem [#allocation8], %s3908_s29  ;;  %vm332_vm0 = vcmask 523264   ;;  %vm1111_vm1 = vcmask 1040384  }
  0x93   : > { %v316_v2 = vld [vmem:[%s4502_s20] sm:$0xff]  ;;  %v317_v3 = vld [vmem:[%s4502_s20 + $0x8] sm:$0xff]  ;;  %v310_v5 = vld [vmem:[%s4494_s12 + $0x10] sm:$0xff]  ;;  %s3359_s26 = sshll.u32 %s4491_s23, 3  ;;  %s3417_s8 = sshll.u32 %s4278_s19, 7 }
  0x94   : > { %v4506_v4 = vsub.f32 %v308_v0, %v316_v2  ;;  %v311_v6 = vld [vmem:[%s4494_s12 + $0x18] sm:$0xff]  ;;  %v4510_v7 = vsub.f32 %v309_v1, %v317_v3  ;;  %v318_v8 = vld [vmem:[%s4502_s20 + $0x10] sm:$0xff]  ;;  %v312_v10 = vld [vmem:[%s4494_s12 + $0x20] sm:$0xff]  ;;  %s281_s22 = scalar_lea.vmem [#allocation9], %s3359_s26  ;;  %s5806_s30 = scalar_lea.hbm %s5854_s4, %s3417_s8 }
  0x95   : > { %v319_v9 = vld [vmem:[%s4502_s20 + $0x18] sm:$0xff]  ;;  %v4515_v11 = vsub.f32 %v310_v5, %v318_v8  ;;  %v313_v13 = vld [vmem:[%s4494_s12 + $0x28] sm:$0xff]  ;;  %v320_v14 = vld [vmem:[%s4502_s20 + $0x20] sm:$0xff]  ;;  %s3238_s14 = sshll.u32 %s281_s22, 4  ;;  %s3225_s19 = scalar_lea.sflag [#allocation4], %s4491_s23  ;;  %s5808_s14 = int_to_ptr.vmem [resolvable:$true] %s3238_s14 }
  0x96   : > { %v4517_v12 = vsub.f32 %v311_v6, %v319_v9  ;;  %v321_v15 = vld [vmem:[%s4502_s20 + $0x28] sm:$0xff]  ;;  %v3762_v16 = vpack.c.bf16 %v4510_v7, %v4506_v4  ;;  %v4524_v17 = vsub.f32 %v312_v10, %v320_v14  ;;  %v314_v19 = vld [vmem:[%s4494_s12 + $0x30] sm:$0xff]  ;;  %v315_v20 = vld [vmem:[%s4494_s12 + $0x38] sm:$0xff]  ;;  %s4148_s13 = scalar_lea.vmem %s5808_s14, 128  ;;  %p5924_p8 = scmp.ne.s32.totalorder %s5872_s27, 0 }
  0x97   : > { %v4526_v18 = vsub.f32 %v313_v13, %v321_v15  ;;  %v322_v22 = vld [vmem:[%s4502_s20 + $0x30] sm:$0xff]  ;;  %v323_v23 = vld [vmem:[%s4502_s20 + $0x38] sm:$0xff]  ;;  %v4534_v24 = vld [vmem:[#allocation2] sm:$0xff]  ;;  %p4149_p9 = scmp.ne.s32.totalorder %s5808_s14, %s4148_s13  ;;  %s4231_s11 = smov [#allocation9]  }
  0x98   : > { %v3766_v21 = vpack.c.bf16 %v4517_v12, %v4515_v11  ;;  %3763 = vmatprep.subr.bf16.mxu0 %v3762_v16  ;;  %3562 = vmatprep.mubr.msk.f32.mxu0 %vm332_vm0, %v4534_v24  ;;  %v4540_v26 = vsub.f32 %v314_v19, %v322_v22  ;;  %v4542_v27 = vsub.f32 %v315_v20, %v323_v23  ;;  %v3368_v28 = vld [vmem:[%s4494_s12 + $0x40] sm:$0xff]  ;;  %v3369_v29 = vld [vmem:[%s4494_s12 + $0x48] sm:$0xff]  ;;  %v3370_v35 = vld [vmem:[%s4494_s12 + $0x50] sm:$0xff]  ;;  %s4152_s25 = sshll.u32 %s4231_s11, 4  ;;  %s4153_s25 = int_to_ptr.vmem [resolvable:$false] %s4152_s25 }
  0x99   : > { %3765 = vmatpush3.bf16.msra.mxu0 %v3762_v16  ;;  %v3770_v25 = vpack.c.bf16 %v4526_v18, %v4524_v17  ;;  %v3376_v30 = vld [vmem:[%s4502_s20 + $0x40] sm:$0xff]  ;;  %v3377_v31 = vld [vmem:[%s4502_s20 + $0x48] sm:$0xff]  ;;  %v3371_v36 = vld [vmem:[%s4494_s12 + $0x58] sm:$0xff]  ;;  %p4150_p0 = pnand %p4149_p9, %p5924_p8  ;;  %s4154_s7 = scalar_lea.vmem %s4153_s25, 256 }
  0x9a   : > { %3767 = vmatprep.subr.bf16.mxu0 %v3766_v21  ;;  %v3774_v32 = vpack.c.bf16 %v4542_v27, %v4540_v26  ;;  %v4550_v33 = vsub.f32 %v3368_v28, %v3376_v30  ;;  %v4552_v34 = vsub.f32 %v3369_v29, %v3377_v31  ;;  %v3378_v37 = vld [vmem:[%s4502_s20 + $0x50] sm:$0xff]  ;;  %v3379_v38 = vld [vmem:[%s4502_s20 + $0x58] sm:$0xff]  ;;  %v292_v39 = vld [vmem:[#allocation5] sm:$0xff]  ;;  %p4155_p1 = scmp.lt.s32.totalorder %s5808_s14, %s4153_s25  ;;  %p4156_p4 = scmp.lt.s32.totalorder %s4154_s7, %s4148_s13 }
  0x9b   : > { %v293_v40 = vld [vmem:[#allocation5 + $0x8] sm:$0xff]  ;;  %v294_v42 = vld [vmem:[#allocation5 + $0x10] sm:$0xff]  ;;  %v295_v43 = vld [vmem:[#allocation5 + $0x18] sm:$0xff]  ;;  %v4564_v48 = vsub.f32 %v3370_v35, %v3378_v37  ;;  %v4566_v49 = vsub.f32 %v3371_v36, %v3379_v38  ;;  %p4151_p10 = pneg %p4150_p0 }
  0x9c   : > { %v4558_v41 = vpack.c.bf16 %v293_v40, %v292_v39  ;;  %v4560_v44 = vpack.c.bf16 %v295_v43, %v294_v42  ;;  %v296_v45 = vld [vmem:[#allocation5 + $0x20] sm:$0xff]  ;;  %v297_v46 = vld [vmem:[#allocation5 + $0x28] sm:$0xff]  ;;  %v3810_v47 = vpack.c.bf16 %v4552_v34, %v4550_v33  ;;  %v298_v56 = vld [vmem:[#allocation5 + $0x30] sm:$0xff]  ;;  %p4157_p6 = por %p4156_p4, %p4155_p1 }
  0x9d   : > { %3769 = vmatpush3.bf16.msra.mxu0 %v3766_v21  ;;  %v3372_v50 = vld [vmem:[%s4494_s12 + $0x60] sm:$0xff]  ;;  %v3373_v51 = vld [vmem:[%s4494_s12 + $0x68] sm:$0xff]  ;;  %v4575_v54 = vpack.c.bf16 %v297_v46, %v296_v45  ;;  %v299_v57 = vld [vmem:[#allocation5 + $0x38] sm:$0xff]  ;;  %v3814_v59 = vpack.c.bf16 %v4566_v49, %v4564_v48 }
  0x9e   : > { %3771 = vmatprep.subr.bf16.mxu0 %v3770_v25  ;;  %3779 = vmatprep.subr.bf16.mxu1 %v4558_v41  ;;  %v3380_v52 = vld [vmem:[%s4502_s20 + $0x60] sm:$0xff]  ;;  %v3381_v53 = vld [vmem:[%s4502_s20 + $0x68] sm:$0xff]  ;;  %v4579_v58 = vld [vmem:[#allocation2 + $0x10] sm:$0xff]  ;;  %v4595_v2 = vpack.c.bf16 %v299_v57, %v298_v56  ;;  %p4158_p11 = pnand %p4157_p6, %p4151_p10 }
  0x9f   : > { %3781 = vmatpush3.bf16.msra.mxu1 %v4558_v41  ;;  %v4577_v55 = vld [vmem:[#allocation2 + $0x8] sm:$0xff]  ;;  %v4583_v60 = vsub.f32 %v3372_v50, %v3380_v52  ;;  %v4585_v61 = vsub.f32 %v3373_v51, %v3381_v53  ;;  %v3374_v62 = vld [vmem:[%s4494_s12 + $0x70] sm:$0xff]  ;;  %v3375_v63 = vld [vmem:[%s4494_s12 + $0x78] sm:$0xff] }
  0xa0   : > { %3783 = vmatprep.subr.bf16.mxu1 %v4560_v44  ;;  %v3382_v0 = vld [vmem:[%s4502_s20 + $0x70] sm:$0xff]  ;;  %v3383_v1 = vld [vmem:[%s4502_s20 + $0x78] sm:$0xff]  ;;  %v300_v5 = vld [vmem:[#allocation5 + $0x40] sm:$0xff] }
  0xa1   : > { %3773 = vmatpush3.bf16.msra.mxu0 %v3770_v25  ;;  %v4599_v3 = vld [vmem:[#allocation2 + $0x18] sm:$0xff]  ;;  %v301_v6 = vld [vmem:[#allocation5 + $0x48] sm:$0xff]  ;;  %v4601_v8 = vld [vmem:[#allocation2 + $0x20] sm:$0xff]  ;;  %v3818_v9 = vpack.c.bf16 %v4585_v61, %v4583_v60  ;;  %v4605_v10 = vsub.f32 %v3374_v62, %v3382_v0  ;;  %v4607_v13 = vsub.f32 %v3375_v63, %v3383_v1 }
  0xa2   : > { %3775 = vmatprep.subr.bf16.mxu0 %v3774_v32  ;;  %v4613_v14 = vpack.c.bf16 %v301_v6, %v300_v5  ;;  %v4617_v15 = vld [vmem:[#allocation2 + $0x28] sm:$0xff]  ;;  %v302_v16 = vld [vmem:[#allocation5 + $0x50] sm:$0xff]  ;;  %v303_v19 = vld [vmem:[#allocation5 + $0x58] sm:$0xff] }
  0xa3   : > { %3785 = vmatpush3.bf16.msra.mxu1 %v4560_v44  ;;  %v4619_v20 = vld [vmem:[#allocation2 + $0x30] sm:$0xff]  ;;  %v3822_v21 = vpack.c.bf16 %v4607_v13, %v4605_v10  ;;  %v4627_v22 = vpack.c.bf16 %v303_v19, %v302_v16  ;;  %v4631_v23 = vld [vmem:[#allocation2 + $0x38] sm:$0xff]  ;;  %v304_v25 = vld [vmem:[#allocation5 + $0x60] sm:$0xff] }
  0xa4   : > { %3787 = vmatprep.subr.bf16.mxu1 %v4575_v54  ;;  %v305_v28 = vld [vmem:[#allocation5 + $0x68] sm:$0xff]  ;;  %v306_v30 = vld [vmem:[#allocation5 + $0x70] sm:$0xff]  ;;  %v307_v31 = vld [vmem:[#allocation5 + $0x78] sm:$0xff] }
  0xa5   : > { %3777 = vmatpush3.bf16.msra.mxu0 %v3774_v32  ;;  %v4637_v29 = vpack.c.bf16 %v305_v28, %v304_v25  ;;  %v4646_v32 = vpack.c.bf16 %v307_v31, %v306_v30  ;;  %v3392_v35 = vld [vmem:[%s4494_s12 + $0x80] sm:$0xff]  ;;  %v3393_v36 = vld [vmem:[%s4494_s12 + $0x88] sm:$0xff]  ;;  %v3394_v43 = vld [vmem:[%s4494_s12 + $0x90] sm:$0xff] }
  0xa6   : > { %3811 = vmatprep.subr.bf16.mxu0 %v3810_v47  ;;  %v3400_v37 = vld [vmem:[%s4502_s20 + $0x80] sm:$0xff]  ;;  %v3401_v38 = vld [vmem:[%s4502_s20 + $0x88] sm:$0xff]  ;;  %v3395_v45 = vld [vmem:[%s4494_s12 + $0x98] sm:$0xff] }
  0xa7   : > { %3789 = vmatpush3.bf16.msra.mxu1 %v4575_v54  ;;  %v4682_v39 = vsub.f32 %v3392_v35, %v3400_v37  ;;  %v4684_v40 = vsub.f32 %v3393_v36, %v3401_v38  ;;  %v3402_v46 = vld [vmem:[%s4502_s20 + $0x90] sm:$0xff]  ;;  %v3396_v52 = vld [vmem:[%s4494_s12 + $0xa0] sm:$0xff]  ;;  %v3397_v53 = vld [vmem:[%s4494_s12 + $0xa8] sm:$0xff] }
  0xa8   : > { %3563 = vmatmul.mubr.msk.f32.vlgmr.msra.gmra.mrb[0].mxu0 %vm332_vm0, %v4577_v55  ;;  %3791 = vmatprep.subr.bf16.mxu1 %v4595_v2  ;;  %v4692_v50 = vsub.f32 %v3394_v43, %v3402_v46  ;;  %v3404_v56 = vld [vmem:[%s4502_s20 + $0xa0] sm:$0xff]  ;;  %v3405_v57 = vld [vmem:[%s4502_s20 + $0xa8] sm:$0xff]  ;;  %v3398_v5 = vld [vmem:[%s4494_s12 + $0xb0] sm:$0xff] }
  0xa9   : > { %3813 = vmatpush3.bf16.msra.mxu0 %v3810_v47  ;;  %3565 = vmatprep.mubr.msk.f32.mxu0 %vm332_vm0, %v4579_v58  ;;  %v3858_v42 = vpack.c.bf16 %v4684_v40, %v4682_v39  ;;  %v3403_v47 = vld [vmem:[%s4502_s20 + $0x98] sm:$0xff]  ;;  %v4702_v0 = vsub.f32 %v3396_v52, %v3404_v56  ;;  %v4704_v1 = vsub.f32 %v3397_v53, %v3405_v57  ;;  %v659_v56 = vlaneseq }
  0xaa   : > { %3815 = vmatprep.subr.bf16.mxu0 %v3814_v59  ;;  %5891 = vst [vmem:[#allocation14_spill] sm:$0xff] %v4692_v50  ;;  %v4694_v51 = vsub.f32 %v3395_v45, %v3403_v47  ;;  %v3399_v6 = vld [vmem:[%s4494_s12 + $0xb8] sm:$0xff] }
  0xab   : > { %3793 = vmatpush3.bf16.msra.mxu1 %v4595_v2  ;;  %5893 = vst [vmem:[#allocation16_spill] sm:$0xff] %v4702_v0  ;;  %5894 = vst [vmem:[#allocation17_spill] sm:$0xff] %v4704_v1  ;;  %v3407_v16 = vld [vmem:[%s4502_s20 + $0xb8] sm:$0xff]  ;;  %v3866_v25 = vpack.c.bf16 %v4704_v1, %v4702_v0 }
  0xac   : > { %3566 = vmatmul.mubr.msk.f32.gmra.mrb[2].mxu0 %vm332_vm0, %v4599_v3  ;;  %3795 = vmatprep.subr.bf16.mxu1 %v4613_v14  ;;  %5892 = vst [vmem:[#allocation15_spill] sm:$0xff] %v4694_v51  ;;  %v3862_v63 = vpack.c.bf16 %v4694_v51, %v4692_v50  ;;  %v4714_v30 = vsub.f32 %v3399_v6, %v3407_v16 }
  0xad   : > { %3817 = vmatpush3.bf16.msra.mxu0 %v3814_v59  ;;  %3568 = vmatprep.mubr.msk.f32.mxu0 %vm332_vm0, %v4601_v8 }
  0xae   : > { %3819 = vmatprep.subr.bf16.mxu0 %v3818_v9  ;;  %5896 = vst [vmem:[#allocation19_spill] sm:$0xff] %v4714_v30 }
  0xaf   : > { %3797 = vmatpush3.bf16.msra.mxu1 %v4613_v14 }
  0xb0   : > { %3569 = vmatmul.mubr.msk.f32.gmra.mrb[4].mxu0 %vm332_vm0, %v4617_v15  ;;  %3799 = vmatprep.subr.bf16.mxu1 %v4627_v22 }
  0xb1   : > { %3821 = vmatpush3.bf16.msra.mxu0 %v3818_v9  ;;  %3571 = vmatprep.mubr.msk.f32.mxu0 %vm332_vm0, %v4619_v20  ;;  %v3406_v9 = vld [vmem:[%s4502_s20 + $0xb0] sm:$0xff] }
  0xb2   : > { %3823 = vmatprep.subr.bf16.mxu0 %v3822_v21  ;;  %v4712_v28 = vsub.f32 %v3398_v5, %v3406_v9 }
  0xb3   : > { %3801 = vmatpush3.bf16.msra.mxu1 %v4627_v22 }
  0xb4   : > { %3572 = vmatmul.mubr.msk.f32.gmra.mrb[6].mxu0 %vm332_vm0, %v4631_v23  ;;  %3803 = vmatprep.subr.bf16.mxu1 %v4637_v29  ;;  %5895 = vst [vmem:[#allocation18_spill] sm:$0xff] %v4712_v28  ;;  %v3870_v36 = vpack.c.bf16 %v4714_v30, %v4712_v28 }
  0xb5   : > { %3825 = vmatpush3.bf16.msra.mxu0 %v3822_v21  ;;  %3634 = vmatprep.mubr.msk.f32.mxu0 %vm332_vm0, %v4534_v24 }
  0xb6   : > { %3827 = vmatprep.subr.bf16.mxu0 %v4558_v41 }
  0xb7   : > { %3805 = vmatpush3.bf16.msra.mxu1 %v4637_v29 }
  0xb8   : > { %3635 = vmatmul.mubr.msk.f32.vlgmr.msra.gmra.mrb[8].mxu0 %vm332_vm0, %v4577_v55  ;;  %3807 = vmatprep.subr.bf16.mxu1 %v4646_v32 }
  0xb9   : > { %3637 = vmatprep.mubr.msk.f32.mxu0 %vm332_vm0, %v4579_v58  ;;  %3829 = vmatpush3.bf16.msra.mxu0 %v4558_v41 }
  0xba   : > { %3831 = vmatprep.subr.bf16.mxu0 %v4560_v44 }
  0xbb   : > { %3809 = vmatpush3.bf16.msra.mxu1 %v4646_v32 }
  0xbc   : > { %3638 = vmatmul.mubr.msk.f32.gmra.mrb[10].mxu0 %vm332_vm0, %v4599_v3  ;;  %3859 = vmatprep.subr.bf16.mxu1 %v3858_v42 }
  0xbd   : > { %3640 = vmatprep.mubr.msk.f32.mxu0 %vm332_vm0, %v4601_v8  ;;  %3833 = vmatpush3.bf16.msra.mxu0 %v4560_v44 }
  0xbe   : > { %3835 = vmatprep.subr.bf16.mxu0 %v4575_v54 }
  0xc0   : > { %3641 = vmatmul.mubr.msk.f32.gmra.mrb[12].mxu0 %vm332_vm0, %v4617_v15 }
  0xc1   : > { %3643 = vmatprep.mubr.msk.f32.mxu0 %vm332_vm0, %v4619_v20  ;;  %3837 = vmatpush3.bf16.msra.mxu0 %v4575_v54 }
  0xc2   : > { %3839 = vmatprep.subr.bf16.mxu0 %v4595_v2 }
  0xc4   : > { %3644 = vmatmul.mubr.msk.f32.gmra.mrb[14].mxu0 %vm332_vm0, %v4631_v23 }
  0xc5   : > { %3841 = vmatpush3.bf16.msra.mxu0 %v4595_v2 }
  0xc6   : > { %3843 = vmatprep.subr.bf16.mxu0 %v4613_v14 }
  0xc9   : > { %3845 = vmatpush3.bf16.msra.mxu0 %v4613_v14 }
  0xca   : > { %3847 = vmatprep.subr.bf16.mxu0 %v4627_v22 }
  0xcd   : > { %3849 = vmatpush3.bf16.msra.mxu0 %v4627_v22 }
  0xce   : > { %3851 = vmatprep.subr.bf16.mxu0 %v4637_v29 }
  0xd1   : > { %3853 = vmatpush3.bf16.msra.mxu0 %v4637_v29 }
  0xd2   : > { %3855 = vmatprep.subr.bf16.mxu0 %v4646_v32 }
  0xd5   : > { %3857 = vmatpush3.bf16.msra.mxu0 %v4646_v32 }
 0x17b   : > { %v3564_v59 = vpop.f32.mrb[0].mxu0 }
 0x17c   : > { %v423_v62 = vpop.f32.mrb[1].mxu0 }
 0x17d   : > { %3606 = vmatprep.mubr.f32.mxu1 %v423_v62 }
 0x17e   : > { %3607 = vmatmul.mubr.f32.vlgmr.msra.gmra.mrb[0].mxu1 %v3564_v59 }
 0x17f   : > { %3861 = vmatpush3.bf16.msra.mxu1 %v3858_v42  ;;  %v3567_v19 = vpop.f32.mrb[2].mxu0 }
 0x180   : > { %v433_v21 = vpop.f32.mrb[3].mxu0  ;;  %3863 = vmatprep.subr.bf16.mxu1 %v3862_v63 }
 0x181   : > { %3609 = vmatprep.mubr.f32.mxu1 %v433_v21 }
 0x182   : > { %3610 = vmatmul.mubr.f32.gmra.mrb[2].mxu1 %v3567_v19 }
 0x183   : > { %3865 = vmatpush3.bf16.msra.mxu1 %v3862_v63  ;;  %v3570_v31 = vpop.f32.mrb[4].mxu0 }
 0x184   : > { %v443_v35 = vpop.f32.mrb[5].mxu0  ;;  %3867 = vmatprep.subr.bf16.mxu1 %v3866_v25 }
 0x185   : > { %3612 = vmatprep.mubr.f32.mxu1 %v443_v35 }
 0x186   : > { %3613 = vmatmul.mubr.f32.gmra.mrb[4].mxu1 %v3570_v31 }
 0x187   : > { %3869 = vmatpush3.bf16.msra.mxu1 %v3866_v25  ;;  %v3573_v37 = vpop.f32.mrb[6].mxu0 }
 0x188   : > { %v453_v38 = vpop.f32.mrb[7].mxu0  ;;  %3871 = vmatprep.subr.bf16.mxu1 %v3870_v36 }
 0x189   : > { %3615 = vmatprep.mubr.f32.mxu1 %v453_v38 }
 0x18a   : > { %3616 = vmatmul.mubr.f32.gmra.mrb[6].mxu1 %v3573_v37 }
 0x18b   : > { %3873 = vmatpush3.bf16.msra.mxu1 %v3870_v36  ;;  %v3636_v42 = vpop.f32.mrb[8].mxu0  ;;  %3706 = vmatprep.mubr.msk.f32.mxu1 %vm332_vm0, %v4534_v24 }
 0x18c   : > { %v1380_v43 = vpop.f32.mrb[9].mxu0  ;;  %3875 = vmatprep.subr.bf16.mxu1 %v4558_v41 }
 0x18d   : > { %3678 = vmatprep.mubr.f32.mxu0 %v1380_v43 }
 0x18e   : > { %3679 = vmatmul.mubr.f32.vlgmr.msra.gmra.mrb[16].mxu0 %v3636_v42  ;;  %3707 = vmatmul.mubr.msk.f32.vlgmr.msra.gmra.mrb[8].mxu1 %vm332_vm0, %v4577_v55 }
 0x18f   : > { %v3639_v45 = vpop.f32.mrb[10].mxu0  ;;  %3709 = vmatprep.mubr.msk.f32.mxu1 %vm332_vm0, %v4579_v58  ;;  %3877 = vmatpush3.bf16.msra.mxu1 %v4558_v41 }
 0x190   : > { %v1390_v46 = vpop.f32.mrb[11].mxu0  ;;  %3879 = vmatprep.subr.bf16.mxu1 %v4560_v44 }
 0x191   : > { %3681 = vmatprep.mubr.f32.mxu0 %v1390_v46 }
 0x192   : > { %3682 = vmatmul.mubr.f32.gmra.mrb[18].mxu0 %v3639_v45  ;;  %3710 = vmatmul.mubr.msk.f32.gmra.mrb[10].mxu1 %vm332_vm0, %v4599_v3 }
 0x193   : > { %v3642_v24 = vpop.f32.mrb[12].mxu0  ;;  %3712 = vmatprep.mubr.msk.f32.mxu1 %vm332_vm0, %v4601_v8  ;;  %3881 = vmatpush3.bf16.msra.mxu1 %v4560_v44 }
 0x194   : > { %v1400_v55 = vpop.f32.mrb[13].mxu0  ;;  %3883 = vmatprep.subr.bf16.mxu1 %v4575_v54 }
 0x195   : > { %3684 = vmatprep.mubr.f32.mxu0 %v1400_v55 }
 0x196   : > { %3685 = vmatmul.mubr.f32.gmra.mrb[20].mxu0 %v3642_v24  ;;  %3713 = vmatmul.mubr.msk.f32.gmra.mrb[12].mxu1 %vm332_vm0, %v4617_v15 }
 0x197   : > { %v3645_v41 = vpop.f32.mrb[14].mxu0  ;;  %3715 = vmatprep.mubr.msk.f32.mxu1 %vm332_vm0, %v4619_v20  ;;  %3885 = vmatpush3.bf16.msra.mxu1 %v4575_v54 }
 0x198   : > { %v1410_v58 = vpop.f32.mrb[15].mxu0  ;;  %3887 = vmatprep.subr.bf16.mxu1 %v4595_v2 }
 0x199   : > { %3687 = vmatprep.mubr.f32.mxu0 %v1410_v58 }
 0x19a   : > { %3688 = vmatmul.mubr.f32.gmra.mrb[22].mxu0 %v3645_v41  ;;  %3716 = vmatmul.mubr.msk.f32.gmra.mrb[14].mxu1 %vm332_vm0, %v4631_v23 }
 0x19b   : > { %3889 = vmatpush3.bf16.msra.mxu1 %v4595_v2 }
 0x19c   : > { %3891 = vmatprep.subr.bf16.mxu1 %v4613_v14 }
 0x19f   : > { %3893 = vmatpush3.bf16.msra.mxu1 %v4613_v14 }
 0x1a0   : > { %3895 = vmatprep.subr.bf16.mxu1 %v4627_v22 }
 0x1a3   : > { %3897 = vmatpush3.bf16.msra.mxu1 %v4627_v22 }
 0x1a4   : > { %3899 = vmatprep.subr.bf16.mxu1 %v4637_v29 }
 0x1a7   : > { %3901 = vmatpush3.bf16.msra.mxu1 %v4637_v29 }
 0x1a8   : > { %3903 = vmatprep.subr.bf16.mxu1 %v4646_v32 }
 0x1ab   : > { %3905 = vmatpush3.bf16.msra.mxu1 %v4646_v32  ;;  %v4230_v32 = vmov 1966171168  }
 0x1ac   : > { %v657_v53 = vunpack.c.l.s4 %v4230_v32 }
 0x1ae   : > { %v658_v6 = vunpack.c.0.s8 %v657_v53 }
 0x251   : > { %v3608_v44 = vpop.f32.mrb[0].mxu1 }
 0x252   : > { %v568_v54 = vsub.f32 %v4510_v7, %v3608_v44  ;;  %v528_v2 = vpop.f32.mrb[1].mxu1 }
 0x253   : > { %v567_v3 = vsub.f32 %v4506_v4, %v528_v2 }
 0x254   : > { %v576_v8 = vmul.f32 %v568_v54, %v568_v54 }
 0x255   : > { %v575_v14 = vmul.f32 %v567_v3, %v567_v3  ;;  %v3611_v15 = vpop.f32.mrb[2].mxu1 }
 0x256   : > { %v584_v20 = vadd.f32 1e-06, %v576_v8  ;;  %v570_v22 = vsub.f32 %v4517_v12, %v3611_v15  ;;  %v538_v23 = vpop.f32.mrb[3].mxu1 }
 0x257   : > { %v583_v47 = vadd.f32 1e-06, %v575_v14  ;;  %v569_v29 = vsub.f32 %v4515_v11, %v538_v23  ;;  %v660_v11 = vshrl.u32 %v659_v56, 7 }
 0x258   : > { %3984 = vrsqrt.f32 %v584_v20  ;;  %v578_v7 = vmul.f32 %v570_v22, %v570_v22  ;;  %vm600_vm2 = vcmp.eq.f32.partialorder %v584_v20, inf  ;;  %vm602_vm3 = vcmp.eq.f32.partialorder %v584_v20, 0.0 }
 0x259   : > { %3986 = vrsqrt.f32 %v583_v47  ;;  %v3614_v52 = vpop.f32.mrb[4].mxu1  ;;  %v577_v57 = vmul.f32 %v569_v29, %v569_v29  ;;  %v4766_v31 = vsub.s32 %v658_v6, %v660_v11  ;;  %v603_v42 = vand.u32 2147483648, %v584_v20 }
 0x25a   : > { %v548_v59 = vpop.f32.mrb[5].mxu1  ;;  %v572_v4 = vsub.f32 %v4526_v18, %v3614_v52  ;;  %v4755_v62 = vadd.f32 1e-06, %v578_v7  ;;  %vm593_vm4 = vcmp.eq.f32.partialorder %v583_v47, inf  ;;  %vm595_vm5 = vcmp.eq.f32.partialorder %v583_v47, 0.0 }
 0x25b   : > { %v4757_v63 = vadd.f32 1e-06, %v577_v57  ;;  %v571_v12 = vsub.f32 %v4524_v17, %v548_v59  ;;  %v596_v55 = vand.u32 2147483648, %v583_v47 }
 0x25c   : > { %3988 = vrsqrt.f32 %v4755_v62  ;;  %v580_v16 = vmul.f32 %v572_v4, %v572_v4  ;;  %vm614_vm6 = vcmp.eq.f32.partialorder %v4755_v62, inf  ;;  %vm616_vm7 = vcmp.eq.f32.partialorder %v4755_v62, 0.0 }
 0x25d   : > { %v3617_v5 = vpop.f32.mrb[6].mxu1  ;;  %3990 = vrsqrt.f32 %v4757_v63  ;;  %v579_v19 = vmul.f32 %v571_v12, %v571_v12  ;;  %vm607_vm8 = vcmp.eq.f32.partialorder %v4757_v63, inf  ;;  %vm609_vm9 = vcmp.eq.f32.partialorder %v4757_v63, 0.0 }
 0x25e   : > { %v4761_v9 = vpop.f32.mrb[7].mxu1  ;;  %v4770_v38 = vadd.f32 1e-06, %v580_v16  ;;  %v574_v46 = vsub.f32 %v4542_v27, %v3617_v5 }
 0x25f   : > { %v4772_v45 = vadd.f32 1e-06, %v579_v19 }
 0x260   : > { %3992 = vrsqrt.f32 %v4770_v38  ;;  %vm628_vm10 = vcmp.eq.f32.partialorder %v4770_v38, inf  ;;  %vm630_vm11 = vcmp.eq.f32.partialorder %v4770_v38, 0.0 }
 0x261   : > { %v3708_v21 = vpop.f32.mrb[8].mxu1  ;;  %v4764_v25 = vpop.f32.mrb[16].mxu0  ;;  %3994 = vrsqrt.f32 %v4772_v45  ;;  %vm621_vm12 = vcmp.eq.f32.partialorder %v4772_v45, inf  ;;  %vm623_vm13 = vcmp.eq.f32.partialorder %v4772_v45, 0.0 }
 0x262   : > { %v3985_v18 = vpop.eup %3984  ;;  %v2336_v35 = vpop.f32.mrb[9].mxu1 }
 0x263   : > { %v4768_v17 = vpop.f32.mrb[17].mxu0  ;;  %v3987_v36 = vpop.eup %3986  ;;  %v599_v37 = vmul.f32 %v3985_v18, %v584_v20  ;;  %3750 = vmatprep.mubr.f32.mxu1 %v2336_v35 }
 0x264   : > { %v592_v43 = vmul.f32 %v3987_v36, %v583_v47  ;;  %3751 = vmatmul.mubr.f32.vlgmr.msra.gmra.mrb[16].mxu1 %v3708_v21 }
 0x265   : > { %v601_v24 = vsel %vm600_vm2, %v584_v20, %v599_v37  ;;  %v4775_v41 = vpop.f32.mrb[18].mxu0  ;;  %v3711_v58 = vpop.f32.mrb[10].mxu1 }
 0x266   : > { %v604_v44 = vsel %vm602_vm3, %v603_v42, %v601_v24  ;;  %v594_v54 = vsel %vm593_vm4, %v583_v47, %v592_v43  ;;  %v4779_v8 = vpop.f32.mrb[19].mxu0  ;;  %v2346_v14 = vpop.f32.mrb[11].mxu1  ;;  %v4785_v47 = vmul.f32 %v574_v46, %v574_v46 }
 0x267   : > { %v704_v15 = vcombine.high %v604_v44, %v604_v44  ;;  %v711_v27 = vrot.slane %v604_v44, %v4766_v31  ;;  %v597_v22 = vsel %vm595_vm5, %v596_v55, %v594_v54  ;;  %3753 = vmatprep.mubr.f32.mxu1 %v2346_v14  ;;  %v3989_v20 = vpop.eup %3988 }
 0x268   : > { %v655_v23 = vcombine.high %v597_v22, %v597_v22  ;;  %v662_v29 = vrot.slane %v597_v22, %v4766_v31  ;;  %3754 = vmatmul.mubr.f32.gmra.mrb[18].mxu1 %v3711_v58  ;;  %v3991_v52 = vpop.eup %3990  ;;  %v4790_v7 = vmul.f32 %v3989_v20, %v4755_v62 }
 0x269   : > { %v718_v32 = vrot.slane %v704_v15, %v4766_v31  ;;  %v719_v53 = vcombine.high %v711_v27, %v711_v27  ;;  %v727_v56 = vrot.slane %v711_v27, %v4766_v31  ;;  %v4792_v57 = vpop.f32.mrb[20].mxu0  ;;  %v3714_v59 = vpop.f32.mrb[12].mxu1  ;;  %v606_v6 = vmul.f32 %v3991_v52, %v4757_v63 }
 0x26a   : > { %v669_v4 = vrot.slane %v655_v23, %v4766_v31  ;;  %v670_v12 = vcombine.high %v662_v29, %v662_v29  ;;  %v678_v5 = vrot.slane %v662_v29, %v4766_v31  ;;  %v4797_v11 = vpop.f32.mrb[21].mxu0  ;;  %v2356_v16 = vpop.f32.mrb[13].mxu1 }
 0x26b   : > { %v720_v19 = vcombine.high %v718_v32, %v718_v32  ;;  %v734_v21 = vrot.slane %v718_v32, %v4766_v31  ;;  %v741_v18 = vrot.slane %v719_v53, %v4766_v31  ;;  %v749_v35 = vcombine.high %v727_v56, %v727_v56  ;;  %3756 = vmatprep.mubr.f32.mxu1 %v2356_v16  ;;  %v3993_v16 = vpop.eup %3992 }
 0x26c   : > { %v1113_v36 = vsel %vm1111_vm1, %v727_v56, 0.0  ;;  %v671_v37 = vcombine.high %v669_v4, %v669_v4  ;;  %v685_v42 = vrot.slane %v669_v4, %v4766_v31  ;;  %v692_v43 = vrot.slane %v670_v12, %v4766_v31  ;;  %3757 = vmatmul.mubr.f32.gmra.mrb[20].mxu1 %v3714_v59 }
 0x26d   : > { %v748_v46 = vrot.slane %v720_v19, %v4766_v31  ;;  %v750_v24 = vcombine.high %v734_v21, %v734_v21  ;;  %v751_v55 = vcombine.high %v741_v18, %v741_v18  ;;  %v1134_v58 = vsel %vm1111_vm1, %v741_v18, 0.0  ;;  %v4810_v44 = vpop.f32.mrb[22].mxu0  ;;  %v3717_v54 = vpop.f32.mrb[14].mxu1 }
 0x26e   : > { %v1155_v14 = vsel %vm1111_vm1, %v749_v35, 0.0  ;;  %v1197_v15 = vsel %vm1111_vm1, %v734_v21, 0.0  ;;  %v699_v27 = vrot.slane %v671_v37, %v4766_v31  ;;  %v700_v22 = vcombine.high %v678_v5, %v678_v5  ;;  %v4816_v20 = vpop.f32.mrb[23].mxu0  ;;  %v2366_v23 = vpop.f32.mrb[15].mxu1 }
 0x26f   : > { %v752_v29 = vcombine.high %v748_v46, %v748_v46  ;;  %v1176_v52 = vsel %vm1111_vm1, %v751_v55, 0.0  ;;  %v1218_v32 = vsel %vm1111_vm1, %v748_v46, 0.0  ;;  %v1239_v53 = vsel %vm1111_vm1, %v750_v24, 0.0  ;;  %3759 = vmatprep.mubr.f32.mxu1 %v2366_v23  ;;  %v3995_v37 = vpop.eup %3994 }
 0x270   : > { %v701_v56 = vcombine.high %v685_v42, %v685_v42  ;;  %v702_v59 = vcombine.high %v692_v43, %v692_v43  ;;  %v703_v4 = vcombine.high %v699_v27, %v699_v27  ;;  %v1112_v12 = vsel %vm1111_vm1, %v678_v5, 0.0  ;;  %3760 = vmatmul.mubr.f32.gmra.mrb[22].mxu1 %v3717_v54 }
 0x271   : > { %v1260_v19 = vsel %vm1111_vm1, %v752_v29, 0.0  ;;  %v1114_v21 = vadd.f32 %v1113_v36, %v1112_v12  ;;  %v1133_v18 = vsel %vm1111_vm1, %v692_v43, 0.0  ;;  %v1154_v35 = vsel %vm1111_vm1, %v700_v22, 0.0 }
 0x272   : > { %v1135_v55 = vadd.f32 %v1134_v58, %v1133_v18  ;;  %v1156_v46 = vadd.f32 %v1155_v14, %v1154_v35  ;;  %v1175_v24 = vsel %vm1111_vm1, %v702_v59, 0.0  ;;  %v1196_v23 = vsel %vm1111_vm1, %v685_v42, 0.0 }
 0x273   : > { %v4827_v3 = vadd.f32 %v1176_v52, %v1175_v24  ;;  %v1198_v2 = vadd.f32 %v1197_v15, %v1196_v23  ;;  %v1217_v5 = vsel %vm1111_vm1, %v699_v27, 0.0  ;;  %v1238_v54 = vsel %vm1111_vm1, %v701_v56, 0.0 }
 0x274   : > { %v1219_v29 = vadd.f32 %v1218_v32, %v1217_v5  ;;  %v1240_v36 = vadd.f32 %v1239_v53, %v1238_v54  ;;  %v1259_v43 = vsel %vm1111_vm1, %v703_v4, 0.0  ;;  %v615_v58 = vsel %vm614_vm6, %v4755_v62, %v4790_v7 }
 0x275   : > { %v4836_v14 = vadd.f32 %v1260_v19, %v1259_v43  ;;  %v5897_v42 = vand.u32 2147483648, %v4755_v62  ;;  %v608_v27 = vsel %vm607_vm8, %v4757_v63, %v606_v6  ;;  %v627_v22 = vmul.f32 %v3993_v16, %v4770_v38 }
 0x276   : > { %v5898_v53 = vand.u32 2147483648, %v4757_v63  ;;  %v4852_v56 = vadd.f32 1e-06, %v4785_v47  ;;  %v573_v4 = vsub.f32 %v4540_v26, %v4761_v9  ;;  %v631_v63 = vand.u32 2147483648, %v4770_v38 }
 0x277   : > { %v618_v15 = vsel %vm616_vm7, %v5897_v42, %v615_v58  ;;  %v629_v6 = vsel %vm628_vm10, %v4770_v38, %v627_v22  ;;  %v624_v38 = vand.u32 2147483648, %v4772_v45  ;;  %v620_v43 = vmul.f32 %v3995_v37, %v4772_v45 }
 0x278   : > { %v802_v52 = vcombine.high %v618_v15, %v618_v15  ;;  %v809_v32 = vrot.slane %v618_v15, %v4766_v31  ;;  %v611_v7 = vsel %vm609_vm9, %v5898_v53, %v608_v27  ;;  %v632_v5 = vsel %vm630_vm11, %v631_v63, %v629_v6 }
 0x279   : > { %v753_v59 = vcombine.high %v611_v7, %v611_v7  ;;  %v760_v62 = vrot.slane %v611_v7, %v4766_v31  ;;  %3996 = vrsqrt.f32 %v4852_v56  ;;  %v581_v58 = vmul.f32 %v573_v4, %v573_v4 }
 0x27a   : > { %v816_v12 = vrot.slane %v802_v52, %v4766_v31  ;;  %v817_v16 = vcombine.high %v809_v32, %v809_v32  ;;  %v825_v47 = vrot.slane %v809_v32, %v4766_v31  ;;  %v1525_v42 = vsub.f32 %v4552_v34, %v4764_v25 }
 0x27b   : > { %v767_v19 = vrot.slane %v753_v59, %v4766_v31  ;;  %v768_v18 = vcombine.high %v760_v62, %v760_v62  ;;  %v776_v35 = vrot.slane %v760_v62, %v4766_v31  ;;  %v4877_v15 = vsub.f32 %v4550_v33, %v4768_v17 }
 0x27c   : > { %v818_v24 = vcombine.high %v816_v12, %v816_v12  ;;  %v839_v23 = vrot.slane %v817_v16, %v4766_v31  ;;  %v4880_v27 = vrot.slane %v816_v12, %v4766_v31  ;;  %v847_v22 = vcombine.high %v825_v47, %v825_v47 }
 0x27d   : > { %v769_v26 = vcombine.high %v767_v19, %v767_v19  ;;  %v783_v9 = vrot.slane %v767_v19, %v4766_v31  ;;  %v790_v54 = vrot.slane %v768_v18, %v4766_v31  ;;  %v798_v52 = vcombine.high %v776_v35, %v776_v35 }
 0x27e   : > { %v900_v32 = vcombine.high %v632_v5, %v632_v5  ;;  %v4884_v53 = vrot.slane %v818_v24, %v4766_v31  ;;  %v849_v37 = vcombine.high %v839_v23, %v839_v23  ;;  %v1117_v7 = vsel %vm1111_vm1, %v825_v47, 0.0 }
 0x27f   : > { %v4888_v34 = vrot.slane %v769_v26, %v4766_v31  ;;  %v1138_v33 = vsel %vm1111_vm1, %v839_v23, 0.0  ;;  %v799_v25 = vcombine.high %v783_v9, %v783_v9  ;;  %v800_v17 = vcombine.high %v790_v54, %v790_v54 }
 0x280   : > { %v1115_v59 = vsel %vm1111_vm1, %v776_v35, 0.0  ;;  %v1136_v6 = vsel %vm1111_vm1, %v790_v54, 0.0  ;;  %v1157_v4 = vsel %vm1111_vm1, %v798_v52, 0.0  ;;  %v1199_v12 = vsel %vm1111_vm1, %v783_v9, 0.0 }
 0x281   : > { %v1116_v62 = vadd.f32 %v1115_v59, %v1114_v21  ;;  %v1137_v16 = vadd.f32 %v1136_v6, %v1135_v55  ;;  %v1158_v63 = vadd.f32 %v1157_v4, %v1156_v46  ;;  %v1178_v47 = vsel %vm1111_vm1, %v800_v17, 0.0 }
 0x282   : > { %v1200_v19 = vadd.f32 %v1199_v12, %v1198_v2  ;;  %v1159_v18 = vsel %vm1111_vm1, %v847_v22, 0.0  ;;  %v1179_v24 = vadd.f32 %v1178_v47, %v4827_v3  ;;  %v1220_v23 = vsel %vm1111_vm1, %v4888_v34, 0.0 }
 0x283   : > { %v1241_v21 = vsel %vm1111_vm1, %v799_v25, 0.0  ;;  %v1221_v35 = vadd.f32 %v1220_v23, %v1219_v29  ;;  %v907_v54 = vrot.slane %v632_v5, %v4766_v31  ;;  %v914_v55 = vrot.slane %v900_v32, %v4766_v31  ;;  %v3997_v46 = vpop.eup %3996 }
 0x284   : > { %v4901_v26 = vadd.f32 %v1241_v21, %v1240_v36  ;;  %v622_v2 = vsel %vm621_vm12, %v4772_v45, %v620_v43  ;;  %v1118_v9 = vadd.f32 %v1117_v7, %v1116_v62  ;;  %v1139_v22 = vadd.f32 %v1138_v33, %v1137_v16 }
 0x285   : > { %v1160_v3 = vadd.f32 %v1159_v18, %v1158_v63  ;;  %v1180_v52 = vsel %vm1111_vm1, %v849_v37, 0.0  ;;  %v1201_v25 = vsel %vm1111_vm1, %v4880_v27, 0.0  ;;  %v1222_v29 = vsel %vm1111_vm1, %v4884_v53, 0.0 }
 0x286   : > { %v915_v36 = vcombine.high %v907_v54, %v907_v54  ;;  %v625_v5 = vsel %vm623_vm13, %v624_v38, %v622_v2  ;;  %v1181_v32 = vadd.f32 %v1180_v52, %v1179_v24  ;;  %v1202_v17 = vadd.f32 %v1201_v25, %v1200_v19 }
 0x287   : > { %v1223_v59 = vadd.f32 %v1222_v29, %v1221_v35  ;;  %v916_v6 = vcombine.high %v914_v55, %v914_v55  ;;  %v923_v43 = vrot.slane %v907_v54, %v4766_v31  ;;  %v641_v7 = vmul.f32 %v3997_v46, %v4852_v56 }
 0x288   : > { %v4917_v33 = vadd.f32 1e-06, %v581_v58  ;;  %v851_v37 = vcombine.high %v625_v5, %v625_v5  ;;  %v858_v62 = vrot.slane %v625_v5, %v4766_v31  ;;  %vm642_vm14 = vcmp.eq.f32.partialorder %v4852_v56, inf }
 0x289   : > { %v1533_v4 = vmul.f32 %v1525_v42, %v1525_v42  ;;  %v848_v45 = vcombine.high %v4880_v27, %v4880_v27  ;;  %v801_v12 = vcombine.high %v4888_v34, %v4888_v34  ;;  %v937_v16 = vrot.slane %v915_v36, %v4766_v31 }
 0x28a   : > { %v4929_v58 = vrot.slane %v914_v55, %v4766_v31  ;;  %v865_v63 = vrot.slane %v851_v37, %v4766_v31  ;;  %v866_v47 = vcombine.high %v858_v62, %v858_v62  ;;  %v874_v19 = vrot.slane %v858_v62, %v4766_v31 }
 0x28b   : > { %v4934_v42 = vrot.slane %v916_v6, %v4766_v31  ;;  %v945_v27 = vcombine.high %v923_v43, %v923_v43  ;;  %v643_v18 = vsel %vm642_vm14, %v4852_v56, %v641_v7  ;;  %3998 = vrsqrt.f32 %v4917_v33 }
 0x28c   : > { %v867_v24 = vcombine.high %v865_v63, %v865_v63  ;;  %v4939_v34 = vrot.slane %v865_v63, %v4766_v31  ;;  %v888_v23 = vrot.slane %v866_v47, %v4766_v31  ;;  %v896_v21 = vcombine.high %v874_v19, %v874_v19 }
 0x28d   : > { %v947_v35 = vcombine.high %v937_v16, %v937_v16  ;;  %v1121_v54 = vsel %vm1111_vm1, %v923_v43, 0.0  ;;  %v1119_v55 = vsel %vm1111_vm1, %v874_v19, 0.0  ;;  %v645_v46 = vand.u32 2147483648, %v4852_v56 }
 0x28e   : > { %v4946_v2 = vrot.slane %v867_v24, %v4766_v31  ;;  %v898_v52 = vcombine.high %v888_v23, %v888_v23  ;;  %v1120_v25 = vadd.f32 %v1119_v55, %v1118_v9  ;;  %vm644_vm15 = vcmp.eq.f32.partialorder %v4852_v56, 0.0 }
 0x28f   : > { %v1140_v29 = vsel %vm1111_vm1, %v888_v23, 0.0  ;;  %v1161_v36 = vsel %vm1111_vm1, %v896_v21, 0.0  ;;  %v1203_v5 = vsel %vm1111_vm1, %v4939_v34, 0.0  ;;  %v646_v6 = vsel %vm644_vm15, %v645_v46, %v643_v18 }
 0x290   : > { %v1142_v43 = vsel %vm1111_vm1, %v937_v16, 0.0  ;;  %v1141_v7 = vadd.f32 %v1140_v29, %v1139_v22  ;;  %v1162_v37 = vadd.f32 %v1161_v36, %v1160_v3  ;;  %v1182_v62 = vsel %vm1111_vm1, %v898_v52, 0.0 }
 0x291   : > { %v1163_v63 = vsel %vm1111_vm1, %v945_v27, 0.0  ;;  %v1183_v47 = vadd.f32 %v1182_v62, %v1181_v32  ;;  %v1204_v9 = vadd.f32 %v1203_v5, %v1202_v17  ;;  %v1224_v56 = vsel %vm1111_vm1, %v4946_v2, 0.0 }
 0x292   : > { %v1184_v19 = vsel %vm1111_vm1, %v947_v35, 0.0  ;;  %v4959_v24 = vadd.f32 %v1224_v56, %v1223_v59  ;;  %v998_v23 = vcombine.high %v646_v6, %v646_v6  ;;  %v1005_v18 = vrot.slane %v646_v6, %v4766_v31 }
 0x293   : > { %v1122_v21 = vadd.f32 %v1121_v54, %v1120_v25  ;;  %v4962_v16 = vadd.f32 %v1142_v43, %v1141_v7  ;;  %v4964_v22 = vadd.f32 %v1163_v63, %v1162_v37  ;;  %v4966_v3 = vadd.f32 %v1184_v19, %v1183_v47 }
 0x294   : > { %v4969_v32 = vsel %vm1111_vm1, %v848_v45, 0.0  ;;  %v4972_v17 = vsel %vm1111_vm1, %v801_v12, 0.0  ;;  %v1205_v59 = vsel %vm1111_vm1, %v4929_v58, 0.0  ;;  %v1013_v27 = vcombine.high %v1005_v18, %v1005_v18 }
 0x295   : > { %v3999_v35 = vpop.eup %3998  ;;  %v1206_v55 = vadd.f32 %v1205_v59, %v1204_v9  ;;  %v4976_v46 = vadd.f32 1e-06, %v1533_v4  ;;  %v1532_v54 = vmul.f32 %v4877_v15, %v4877_v15  ;;  %v1527_v52 = vsub.f32 %v4566_v49, %v4775_v41 }
 0x296   : > { %v4986_v12 = vsel %vm1111_vm1, %v4934_v42, 0.0  ;;  %v4989_v25 = vrot.slane %v998_v23, %v4766_v31  ;;  %v1021_v29 = vrot.slane %v1005_v18, %v4766_v31  ;;  %v634_v4 = vmul.f32 %v3999_v35, %v4917_v33 }
 0x297   : > { %vm635_vm0 = vcmp.eq.f32.partialorder %v4917_v33, inf  ;;  %vm637_vm2 = vcmp.eq.f32.partialorder %v4917_v33, 0.0  ;;  %4000 = vrsqrt.f32 %v4976_v46  ;;  %v5001_v15 = vrot.slane %v1013_v27, %v4766_v31 }
 0x298   : > { %v638_v36 = vand.u32 2147483648, %v4917_v33  ;;  %v636_v5 = vsel %vm635_vm0, %v4917_v33, %v634_v4  ;;  %v5005_v6 = vadd.f32 1e-06, %v1532_v54  ;;  %v1535_v43 = vmul.f32 %v1527_v52, %v1527_v52 }
 0x299   : > { %v1526_v7 = vsub.f32 %v4564_v48, %v4779_v8  ;;  %v5011_v37 = vrot.slane %v4989_v25, %v4766_v31  ;;  %v1043_v62 = vcombine.high %v1021_v29, %v1021_v29  ;;  %v1125_v63 = vsel %vm1111_vm1, %v1021_v29, 0.0 }
 0x29a   : > { %v639_v47 = vsel %vm637_vm2, %v638_v36, %v636_v5  ;;  %vm1557_vm3 = vcmp.eq.f32.partialorder %v4976_v46, inf  ;;  %4002 = vrsqrt.f32 %v5005_v6  ;;  %vm1559_vm4 = vcmp.eq.f32.partialorder %v4976_v46, 0.0 }
 0x29b   : > { %v949_v9 = vcombine.high %v639_v47, %v639_v47  ;;  %v956_v56 = vrot.slane %v639_v47, %v4766_v31  ;;  %v5020_v48 = vadd.f32 1e-06, %v1535_v43  ;;  %v1534_v8 = vmul.f32 %v1526_v7, %v1526_v7 }
 0x29c   : > { %v1529_v59 = vsub.f32 %v4585_v61, %v4792_v57  ;;  %v1146_v27 = vsel %vm1111_vm1, %v5001_v15, 0.0  ;;  %v1167_v35 = vsel %vm1111_vm1, %v1043_v62, 0.0  ;;  %v1560_v54 = vand.u32 2147483648, %v4976_v46 }
 0x29d   : > { %v5023_v19 = vrot.slane %v949_v9, %v4766_v31  ;;  %v964_v23 = vcombine.high %v956_v56, %v956_v56  ;;  %v972_v18 = vrot.slane %v956_v56, %v4766_v31  ;;  %4004 = vrsqrt.f32 %v5020_v48 }
 0x29e   : > { %v1528_v36 = vsub.f32 %v4583_v60, %v4797_v11  ;;  %vm1550_vm5 = vcmp.eq.f32.partialorder %v5005_v6, inf  ;;  %vm1552_vm6 = vcmp.eq.f32.partialorder %v5005_v6, 0.0  ;;  %v5043_v57 = vadd.f32 1e-06, %v1534_v8 }
 0x29f   : > { %v5035_v52 = vrot.slane %v5023_v19, %v4766_v31  ;;  %v986_v29 = vrot.slane %v964_v23, %v4766_v31  ;;  %v994_v4 = vcombine.high %v972_v18, %v972_v18  ;;  %v1123_v61 = vsel %vm1111_vm1, %v972_v18, 0.0 }
 0x2a0   : > { %v1124_v7 = vadd.f32 %v1123_v61, %v1122_v21  ;;  %v1553_v62 = vand.u32 2147483648, %v5005_v6  ;;  %v1537_v47 = vmul.f32 %v1529_v59, %v1529_v59  ;;  %4006 = vrsqrt.f32 %v5043_v57 }
 0x2a1   : > { %v4001_v5 = vpop.eup %4000  ;;  %v996_v43 = vcombine.high %v986_v29, %v986_v29  ;;  %v1144_v9 = vsel %vm1111_vm1, %v986_v29, 0.0  ;;  %v1165_v56 = vsel %vm1111_vm1, %v994_v4, 0.0  ;;  %v1207_v60 = vsel %vm1111_vm1, %v5035_v52, 0.0 }
 0x2a2   : > { %v1556_v11 = vmul.f32 %v4001_v5, %v4976_v46  ;;  %v5051_v23 = vadd.f32 %v1125_v63, %v1124_v7  ;;  %v1145_v8 = vadd.f32 %v1144_v9, %v4962_v16  ;;  %v1166_v18 = vadd.f32 %v1165_v56, %v4964_v22 }
 0x2a3   : > { %v1186_v21 = vsel %vm1111_vm1, %v996_v43, 0.0  ;;  %v5059_v59 = vadd.f32 %v1207_v60, %v1206_v55  ;;  %vm1571_vm7 = vcmp.eq.f32.partialorder %v5020_v48, inf  ;;  %vm1573_vm8 = vcmp.eq.f32.partialorder %v5020_v48, 0.0 }
 0x2a4   : > { %v5057_v61 = vadd.f32 %v1186_v21, %v4966_v3  ;;  %v1558_v29 = vsel %vm1557_vm3, %v4976_v46, %v1556_v11  ;;  %v4003_v4 = vpop.eup %4002  ;;  %v5065_v63 = vadd.f32 %v1146_v27, %v1145_v8  ;;  %v5067_v5 = vadd.f32 %v1167_v35, %v1166_v18 }
 0x2a5   : > { %v1561_v16 = vsel %vm1559_vm4, %v1560_v54, %v1558_v29  ;;  %v1549_v55 = vmul.f32 %v4003_v4, %v5005_v6  ;;  %v1574_v27 = vand.u32 2147483648, %v5020_v48  ;;  %v5078_v7 = vadd.f32 1e-06, %v1537_v47 }
 0x2a6   : > { %v1661_v22 = vcombine.high %v1561_v16, %v1561_v16  ;;  %v1668_v3 = vrot.slane %v1561_v16, %v4766_v31  ;;  %v5080_v35 = vmul.f32 %v1528_v36, %v1528_v36  ;;  %vm1564_vm9 = vcmp.eq.f32.partialorder %v5043_v57, inf }
 0x2a7   : > { %v4005_v46 = vpop.eup %4004  ;;  %v1551_v60 = vsel %vm1550_vm5, %v5005_v6, %v1549_v55  ;;  %vm1566_vm10 = vcmp.eq.f32.partialorder %v5043_v57, 0.0  ;;  %4008 = vrsqrt.f32 %v5078_v7  ;;  %vm1585_vm11 = vcmp.eq.f32.partialorder %v5078_v7, inf }
 0x2a8   : > { %v1675_v54 = vrot.slane %v1661_v22, %v4766_v31  ;;  %v1676_v9 = vcombine.high %v1668_v3, %v1668_v3  ;;  %v1684_v56 = vrot.slane %v1668_v3, %v4766_v31  ;;  %v1554_v8 = vsel %vm1552_vm6, %v1553_v62, %v1551_v60 }
 0x2a9   : > { %v1570_v47 = vmul.f32 %v4005_v46, %v5020_v48  ;;  %v1612_v22 = vcombine.high %v1554_v8, %v1554_v8  ;;  %v1619_v3 = vrot.slane %v1554_v8, %v4766_v31  ;;  %vm1587_vm12 = vcmp.eq.f32.partialorder %v5078_v7, 0.0 }
 0x2aa   : > { %v1677_v18 = vcombine.high %v1675_v54, %v1675_v54  ;;  %v1691_v21 = vrot.slane %v1675_v54, %v4766_v31  ;;  %v1698_v29 = vrot.slane %v1676_v9, %v4766_v31  ;;  %v1706_v4 = vcombine.high %v1684_v56, %v1684_v56  ;;  %v4007_v8 = vpop.eup %4006 }
 0x2ab   : > { %v2069_v16 = vsel %vm1111_vm1, %v1684_v56, 0.0  ;;  %v1572_v6 = vsel %vm1571_vm7, %v5020_v48, %v1570_v47  ;;  %v1626_v56 = vrot.slane %v1612_v22, %v4766_v31  ;;  %v1627_v41 = vcombine.high %v1619_v3, %v1619_v3 }
 0x2ac   : > { %v1705_v62 = vrot.slane %v1677_v18, %v4766_v31  ;;  %v1707_v55 = vcombine.high %v1691_v21, %v1691_v21  ;;  %v1708_v46 = vcombine.high %v1698_v29, %v1698_v29  ;;  %v2090_v60 = vsel %vm1111_vm1, %v1698_v29, 0.0 }
 0x2ad   : > { %v2111_v54 = vsel %vm1111_vm1, %v1706_v4, 0.0  ;;  %v2153_v9 = vsel %vm1111_vm1, %v1691_v21, 0.0  ;;  %v1628_v29 = vcombine.high %v1626_v56, %v1626_v56  ;;  %v1635_v36 = vrot.slane %v1619_v3, %v4766_v31 }
 0x2ae   : > { %v1709_v38 = vcombine.high %v1705_v62, %v1705_v62  ;;  %v2132_v45 = vsel %vm1111_vm1, %v1708_v46, 0.0  ;;  %v2174_v47 = vsel %vm1111_vm1, %v1705_v62, 0.0  ;;  %v2195_v18 = vsel %vm1111_vm1, %v1707_v55, 0.0 }
 0x2af   : > { %v1642_v4 = vrot.slane %v1626_v56, %v4766_v31  ;;  %v1649_v21 = vrot.slane %v1627_v41, %v4766_v31  ;;  %v1575_v11 = vsel %vm1573_vm8, %v1574_v27, %v1572_v6  ;;  %v1563_v46 = vmul.f32 %v4007_v8, %v5043_v57 }
 0x2b0   : > { %v2216_v22 = vsel %vm1111_vm1, %v1709_v38, 0.0  ;;  %v1656_v62 = vrot.slane %v1628_v29, %v4766_v31  ;;  %v1657_v55 = vcombine.high %v1635_v36, %v1635_v36  ;;  %v2068_v3 = vsel %vm1111_vm1, %v1635_v36, 0.0 }
 0x2b1   : > { %v1658_v43 = vcombine.high %v1642_v4, %v1642_v4  ;;  %v1659_v33 = vcombine.high %v1649_v21, %v1649_v21  ;;  %v2089_v56 = vsel %vm1111_vm1, %v1649_v21, 0.0  ;;  %v2152_v41 = vsel %vm1111_vm1, %v1642_v4, 0.0 }
 0x2b2   : > { %v1759_v49 = vcombine.high %v1575_v11, %v1575_v11  ;;  %v1660_v38 = vcombine.high %v1656_v62, %v1656_v62  ;;  %v2070_v28 = vadd.f32 %v2069_v16, %v2068_v3  ;;  %v5121_v48 = vadd.f32 %v2090_v60, %v2089_v56 }
 0x2b3   : > { %v2110_v27 = vsel %vm1111_vm1, %v1657_v55, 0.0  ;;  %v2131_v8 = vsel %vm1111_vm1, %v1659_v33, 0.0  ;;  %v5127_v29 = vadd.f32 %v2153_v9, %v2152_v41  ;;  %v2173_v30 = vsel %vm1111_vm1, %v1656_v62, 0.0 }
 0x2b4   : > { %v5124_v6 = vadd.f32 %v2111_v54, %v2110_v27  ;;  %v2133_v36 = vadd.f32 %v2132_v45, %v2131_v8  ;;  %v5130_v0 = vadd.f32 %v2174_v47, %v2173_v30  ;;  %v2194_v4 = vsel %vm1111_vm1, %v1658_v43, 0.0 }
 0x2b5   : > { %v2215_v21 = vsel %vm1111_vm1, %v1660_v38, 0.0  ;;  %v5134_v16 = vadd.f32 %v2195_v18, %v2194_v4  ;;  %v1766_v54 = vrot.slane %v1575_v11, %v4766_v31  ;;  %v1773_v55 = vrot.slane %v1759_v49, %v4766_v31  ;;  %v4009_v38 = vpop.eup %4008 }
 0x2b6   : > { %v5136_v60 = vadd.f32 %v2216_v22, %v2215_v21  ;;  %v5899_v33 = vcombine.high %v4939_v34, %v4939_v34  ;;  %v5150_v45 = vsel %vm1111_vm1, %v5011_v37, 0.0  ;;  %v1565_v43 = vsel %vm1564_vm9, %v5043_v57, %v1563_v46 }
 0x2b7   : > { %v5900_v49 = vcombine.high %v5001_v15, %v5001_v15  ;;  %v1774_v34 = vcombine.high %v1766_v54, %v1766_v54  ;;  %v1775_v47 = vcombine.high %v1773_v55, %v1773_v55  ;;  %v1782_v18 = vrot.slane %v1766_v54, %v4766_v31 }
 0x2b8   : > { %v5144_v9 = vsel %vm1111_vm1, %v5899_v33, 0.0  ;;  %v5901_v22 = vcombine.high %v5023_v19, %v5023_v19  ;;  %v5902_v3 = vrot.slane %v5051_v23, 4  ;;  %v5174_v15 = vrot.slane %v1773_v55, %v4766_v31 }
 0x2b9   : > { %v5159_v11 = vsel %vm1111_vm1, %v5900_v49, 0.0  ;;  %v5903_v56 = vand.u32 2147483648, %v5043_v57  ;;  %v1796_v19 = vrot.slane %v1774_v34, %v4766_v31  ;;  %v5184_v8 = vadd.f32 1e-06, %v5080_v35 }
 0x2ba   : > { %v5166_v62 = vrot.slane %v5901_v22, %v4766_v31  ;;  %v5171_v46 = vadd.f32 %v5902_v3, %v5051_v23  ;;  %v1588_v21 = vand.u32 2147483648, %v5078_v7  ;;  %v5190_v57 = vrot.slane %v1775_v47, %v4766_v31 }
 0x2bb   : > { %v1568_v41 = vsel %vm1566_vm10, %v5903_v56, %v1565_v43  ;;  %v1804_v54 = vcombine.high %v1782_v18, %v1782_v18  ;;  %v1531_v55 = vsub.f32 %v4607_v13, %v4810_v44  ;;  %v1530_v33 = vsub.f32 %v4605_v10, %v4816_v20 }
 0x2bc   : > { %v1710_v23 = vcombine.high %v1568_v41, %v1568_v41  ;;  %v1717_v4 = vrot.slane %v1568_v41, %v4766_v31  ;;  %v2073_v35 = vsel %vm1111_vm1, %v1782_v18, 0.0  ;;  %v2157_v43 = vsel %vm1111_vm1, %v5174_v15, 0.0 }
 0x2bd   : > { %v1806_v22 = vcombine.high %v1796_v19, %v1796_v19  ;;  %v1584_v47 = vmul.f32 %v4009_v38, %v5078_v7  ;;  %4010 = vrsqrt.f32 %v5184_v8  ;;  %v2094_v13 = vsel %vm1111_vm1, %v1796_v19, 0.0 }
 0x2be   : > { %v1724_v49 = vrot.slane %v1710_v23, %v4766_v31  ;;  %v1725_v34 = vcombine.high %v1717_v4, %v1717_v4  ;;  %v1733_v3 = vrot.slane %v1717_v4, %v4766_v31  ;;  %v2115_v18 = vsel %vm1111_vm1, %v1804_v54, 0.0 }
 0x2bf   : > { %v1586_v23 = vsel %vm1585_vm11, %v5078_v7, %v1584_v47  ;;  %vm1578_vm13 = vcmp.eq.f32.partialorder %v5184_v8, inf  ;;  %vm1580_vm14 = vcmp.eq.f32.partialorder %v5184_v8, 0.0 }
 0x2c0   : > { %v1726_v44 = vcombine.high %v1724_v49, %v1724_v49  ;;  %v1740_v10 = vrot.slane %v1724_v49, %v4766_v31  ;;  %v1747_v20 = vrot.slane %v1725_v34, %v4766_v31  ;;  %v1755_v56 = vcombine.high %v1733_v3, %v1733_v3 }
 0x2c1   : > { %v2071_v41 = vsel %vm1111_vm1, %v1733_v3, 0.0  ;;  %v1589_v54 = vsel %vm1587_vm12, %v1588_v21, %v1586_v23  ;;  %v2136_v3 = vsel %vm1111_vm1, %v1806_v22, 0.0 }
 0x2c2   : > { %v1754_v38 = vrot.slane %v1726_v44, %v4766_v31  ;;  %v1756_v4 = vcombine.high %v1740_v10, %v1740_v10  ;;  %v1757_v30 = vcombine.high %v1747_v20, %v1747_v20  ;;  %v2072_v27 = vadd.f32 %v2071_v41, %v2070_v28 }
 0x2c3   : > { %v2092_v19 = vsel %vm1111_vm1, %v1747_v20, 0.0  ;;  %v2113_v49 = vsel %vm1111_vm1, %v1755_v56, 0.0  ;;  %v2155_v34 = vsel %vm1111_vm1, %v1740_v10, 0.0  ;;  %v2178_v10 = vsel %vm1111_vm1, %v5190_v57, 0.0 }
 0x2c4   : > { %v2093_v1 = vadd.f32 %v2092_v19, %v5121_v48  ;;  %v2114_v47 = vadd.f32 %v2113_v49, %v5124_v6  ;;  %v2134_v44 = vsel %vm1111_vm1, %v1757_v30, 0.0  ;;  %v2156_v28 = vadd.f32 %v2155_v34, %v5127_v29 }
 0x2c5   : > { %v2135_v50 = vadd.f32 %v2134_v44, %v2133_v36  ;;  %v2176_v20 = vsel %vm1111_vm1, %v1754_v38, 0.0  ;;  %v2197_v56 = vsel %vm1111_vm1, %v1756_v4, 0.0  ;;  %v1857_v48 = vcombine.high %v1589_v54, %v1589_v54 }
 0x2c6   : > { %v2177_v7 = vadd.f32 %v2176_v20, %v5130_v0  ;;  %v5228_v21 = vadd.f32 %v2197_v56, %v5134_v16  ;;  %v1864_v6 = vrot.slane %v1589_v54, %v4766_v31  ;;  %v2074_v36 = vadd.f32 %v2073_v35, %v2072_v27 }
 0x2c7   : > { %v2095_v30 = vadd.f32 %v2094_v13, %v2093_v1  ;;  %v1871_v29 = vrot.slane %v1857_v48, %v4766_v31  ;;  %v2116_v22 = vadd.f32 %v2115_v18, %v2114_v47  ;;  %v2137_v41 = vadd.f32 %v2136_v3, %v2135_v50  ;;  %v4011_v4 = vpop.eup %4010 }
 0x2c8   : > { %v2158_v23 = vadd.f32 %v2157_v43, %v2156_v28  ;;  %v1872_v19 = vcombine.high %v1864_v6, %v1864_v6  ;;  %v1581_v49 = vand.u32 2147483648, %v5184_v8  ;;  %v2179_v0 = vadd.f32 %v2178_v10, %v2177_v7 }
 0x2c9   : > { %v1539_v34 = vmul.f32 %v1531_v55, %v1531_v55  ;;  %v1805_v16 = vcombine.high %v5174_v15, %v5174_v15  ;;  %v1758_v44 = vcombine.high %v1754_v38, %v1754_v38  ;;  %v1577_v54 = vmul.f32 %v4011_v4, %v5184_v8 }
 0x2ca   : > { %v1873_v1 = vcombine.high %v1871_v29, %v1871_v29  ;;  %v1880_v27 = vrot.slane %v1864_v6, %v4766_v31  ;;  %v1894_v50 = vrot.slane %v1872_v19, %v4766_v31  ;;  %v1129_v55 = vrot.slane %v5171_v46, 2 }
 0x2cb   : > { %v5240_v35 = vadd.f32 1e-06, %v1539_v34  ;;  %v1579_v15 = vsel %vm1578_vm13, %v5184_v8, %v1577_v54  ;;  %v1538_v13 = vmul.f32 %v1530_v33, %v1530_v33  ;;  %v5904_v18 = vrot.slane %v5065_v63, 4 }
 0x2cc   : > { %v5256_v47 = vrot.slane %v1871_v29, %v4766_v31  ;;  %v1582_v28 = vsel %vm1580_vm14, %v1581_v49, %v1579_v15  ;;  %v5259_v20 = vsel %vm1111_vm1, %v1805_v16, 0.0  ;;  %v5264_v8 = vsel %vm1111_vm1, %v1758_v44, 0.0 }
 0x2cd   : > { %v5251_v38 = vadd.f32 %v5904_v18, %v5065_v63  ;;  %v1808_v56 = vcombine.high %v1582_v28, %v1582_v28  ;;  %v1815_v10 = vrot.slane %v1582_v28, %v4766_v31  ;;  %4012 = vrsqrt.f32 %v5240_v35 }
 0x2ce   : > { %v5267_v63 = vrot.slane %v1873_v1, %v4766_v31  ;;  %v1902_v33 = vcombine.high %v1880_v27, %v1880_v27  ;;  %v1904_v7 = vcombine.high %v1894_v50, %v1894_v50  ;;  %v5271_v4 = vadd.f32 1e-06, %v1538_v13 }
 0x2cf   : > { %v1822_v48 = vrot.slane %v1808_v56, %v4766_v31  ;;  %v1823_v6 = vcombine.high %v1815_v10, %v1815_v10  ;;  %v1831_v29 = vrot.slane %v1815_v10, %v4766_v31  ;;  %v2077_v49 = vsel %vm1111_vm1, %v1880_v27, 0.0 }
 0x2d0   : > { %v2098_v34 = vsel %vm1111_vm1, %v1894_v50, 0.0  ;;  %v2161_v16 = vsel %vm1111_vm1, %v5256_v47, 0.0  ;;  %v2119_v13 = vsel %vm1111_vm1, %v1902_v33, 0.0  ;;  %v5286_v18 = vsel %vm1111_vm1, %v5267_v63, 0.0 }
 0x2d1   : > { %v1824_v44 = vcombine.high %v1822_v48, %v1822_v48  ;;  %v5280_v54 = vrot.slane %v1822_v48, %v4766_v31  ;;  %v1845_v1 = vrot.slane %v1823_v6, %v4766_v31  ;;  %v1853_v15 = vcombine.high %v1831_v29, %v1831_v29 }
 0x2d2   : > { %v2075_v27 = vsel %vm1111_vm1, %v1831_v29, 0.0  ;;  %4014 = vrsqrt.f32 %v5271_v4  ;;  %v2140_v50 = vsel %vm1111_vm1, %v1904_v7, 0.0  ;;  %vm1599_vm15 = vcmp.eq.f32.partialorder %v5240_v35, inf }
 0x2d3   : > { %v5292_v28 = vrot.slane %v1824_v44, %v4766_v31  ;;  %v1855_v56 = vcombine.high %v1845_v1, %v1845_v1  ;;  %v2076_v10 = vadd.f32 %v2075_v27, %v2074_v36  ;;  %v2096_v48 = vsel %vm1111_vm1, %v1845_v1, 0.0 }
 0x2d4   : > { %v2117_v6 = vsel %vm1111_vm1, %v1853_v15, 0.0  ;;  %v2159_v33 = vsel %vm1111_vm1, %v5280_v54, 0.0  ;;  %v2097_v3 = vadd.f32 %v2096_v48, %v2095_v30  ;;  %vm1601_vm0 = vcmp.eq.f32.partialorder %v5240_v35, 0.0 }
 0x2d5   : > { %v2118_v29 = vadd.f32 %v2117_v6, %v2116_v22  ;;  %v2138_v19 = vsel %vm1111_vm1, %v1855_v56, 0.0  ;;  %v2160_v44 = vadd.f32 %v2159_v33, %v2158_v23  ;;  %v2180_v36 = vsel %vm1111_vm1, %v5292_v28, 0.0 }
 0x2d6   : > { %v2139_v7 = vadd.f32 %v2138_v19, %v2137_v41  ;;  %v1602_v1 = vand.u32 2147483648, %v5240_v35  ;;  %v5304_v15 = vadd.f32 %v2180_v36, %v2179_v0  ;;  %v5306_v43 = vadd.f32 %v2077_v49, %v2076_v10 }
 0x2d7   : > { %v4013_v27 = vpop.eup %4012  ;;  %v5308_v51 = vadd.f32 %v2098_v34, %v2097_v3  ;;  %v5310_v30 = vadd.f32 %v2119_v13, %v2118_v29  ;;  %v5315_v41 = vadd.f32 %v2161_v16, %v2160_v44  ;;  %v5905_v0 = vcombine.high %v4989_v25, %v4989_v25 }
 0x2d8   : > { %v1598_v22 = vmul.f32 %v4013_v27, %v5240_v35  ;;  %v5313_v56 = vadd.f32 %v2140_v50, %v2139_v7  ;;  %v1150_v3 = vrot.slane %v5251_v38, 2  ;;  %v1169_v49 = vrot.slane %v5067_v5, 4 }
 0x2d9   : > { %v5323_v19 = vrot.slane %v5905_v0, %v4766_v31  ;;  %v1189_v34 = vadd.f32 %v5159_v11, %v5057_v61  ;;  %v1130_v13 = vadd.f32 %v1129_v55, %v5171_v46  ;;  %v1210_v50 = vadd.f32 %v5150_v45, %v5059_v59 }
 0x2da   : > { %v1600_v16 = vsel %vm1599_vm15, %v5240_v35, %v1598_v22  ;;  %v1227_v25 = vadd.f32 %v4986_v12, %v4959_v24  ;;  %vm1592_vm2 = vcmp.eq.f32.partialorder %v5271_v4, inf  ;;  %v1151_v48 = vadd.f32 %v1150_v3, %v5251_v38 }
 0x2db   : > { %v1603_v10 = vsel %vm1601_vm0, %v1602_v1, %v1600_v16  ;;  %v1170_v61 = vadd.f32 %v1169_v49, %v5067_v5  ;;  %v1190_v46 = vrot.slane %v1189_v34, 4  ;;  %v1211_v55 = vrot.slane %v1210_v50, 4 }
 0x2dc   : > { %v4015_v11 = vpop.eup %4014  ;;  %v1955_v6 = vcombine.high %v1603_v10, %v1603_v10  ;;  %v1962_v33 = vrot.slane %v1603_v10, %v4766_v31  ;;  %v1854_v59 = vcombine.high %v5280_v54, %v5280_v54  ;;  %vm1594_vm3 = vcmp.eq.f32.partialorder %v5271_v4, 0.0 }
 0x2dd   : > { %v1591_v24 = vmul.f32 %v4015_v11, %v5271_v4  ;;  %v1595_v12 = vand.u32 2147483648, %v5271_v4  ;;  %v1131_v35 = vrot.slane %v1130_v13, 1  ;;  %v1152_v5 = vrot.slane %v1151_v48, 1 }
 0x2de   : > { %v5349_v45 = vrot.slane %v1955_v6, %v4766_v31  ;;  %v1171_v38 = vrot.slane %v1170_v61, 2  ;;  %v1970_v29 = vcombine.high %v1962_v33, %v1962_v33  ;;  %v1978_v1 = vrot.slane %v1962_v33, %v4766_v31 }
 0x2df   : > { %v1593_v7 = vsel %vm1592_vm2, %v5271_v4, %v1591_v24  ;;  %v1191_v27 = vadd.f32 %v1190_v46, %v1189_v34  ;;  %v1212_v22 = vadd.f32 %v1211_v55, %v1210_v50  ;;  %v5362_v0 = vsel %vm1111_vm1, %v1854_v59, 0.0 }
 0x2e0   : > { %v1596_v3 = vsel %vm1594_vm3, %v1595_v12, %v1593_v7  ;;  %v1228_v49 = vsel %vm1111_vm1, %v5166_v62, 0.0  ;;  %v5370_v10 = vadd.f32 %v1131_v35, %v1130_v13  ;;  %v5372_v11 = vadd.f32 %v1152_v5, %v1151_v48 }
 0x2e1   : > { %v1172_v6 = vadd.f32 %v1171_v38, %v1170_v61  ;;  %v5376_v34 = vrot.slane %v5349_v45, %v4766_v31  ;;  %v1992_v50 = vrot.slane %v1970_v29, %v4766_v31  ;;  %v1906_v33 = vcombine.high %v1596_v3, %v1596_v3 }
 0x2e2   : > { %v1913_v46 = vrot.slane %v1596_v3, %v4766_v31  ;;  %v2000_v55 = vcombine.high %v1978_v1, %v1978_v1  ;;  %v1192_v59 = vrot.slane %v1191_v27, 2  ;;  %v1213_v24 = vrot.slane %v1212_v22, 2 }
 0x2e3   : > { %v1229_v12 = vadd.f32 %v1228_v49, %v1227_v25  ;;  %v1920_v7 = vrot.slane %v1906_v33, %v4766_v31  ;;  %v1230_v61 = vsel %vm1111_vm1, %v5323_v19, 0.0  ;;  %v2081_v35 = vsel %vm1111_vm1, %v1978_v1, 0.0 }
 0x2e4   : > { %v1921_v13 = vcombine.high %v1913_v46, %v1913_v46  ;;  %v1929_v48 = vrot.slane %v1913_v46, %v4766_v31  ;;  %v1173_v5 = vrot.slane %v1172_v6, 1  ;;  %v1244_v29 = vadd.f32 %v4969_v32, %v4901_v26 }
 0x2e5   : > { %v1231_v38 = vadd.f32 %v1230_v61, %v1229_v12  ;;  %v2002_v3 = vcombine.high %v1992_v50, %v1992_v50  ;;  %v5388_v36 = vrot.slane %v1920_v7, %v4766_v31  ;;  %v2102_v33 = vsel %vm1111_vm1, %v1992_v50, 0.0 }
 0x2e6   : > { %v1943_v25 = vrot.slane %v1921_v13, %v4766_v31  ;;  %v1951_v49 = vcombine.high %v1929_v48, %v1929_v48  ;;  %v2123_v46 = vsel %vm1111_vm1, %v2000_v55, 0.0  ;;  %v2079_v16 = vsel %vm1111_vm1, %v1929_v48, 0.0 }
 0x2e7   : > { %v1232_v4 = vrot.slane %v1231_v38, 4  ;;  %v2080_v12 = vadd.f32 %v2079_v16, %v5306_v43  ;;  %v1193_v61 = vadd.f32 %v1192_v59, %v1191_v27  ;;  %v1214_v54 = vadd.f32 %v1213_v24, %v1212_v22 }
 0x2e8   : > { %v1953_v1 = vcombine.high %v1943_v25, %v1943_v25  ;;  %v2100_v26 = vsel %vm1111_vm1, %v1943_v25, 0.0  ;;  %v2121_v32 = vsel %vm1111_vm1, %v1951_v49, 0.0  ;;  %v2163_v13 = vsel %vm1111_vm1, %v5388_v36, 0.0 }
 0x2e9   : > { %v5906_v50 = vcombine.high %v4929_v58, %v4929_v58  ;;  %v2082_v23 = vadd.f32 %v2081_v35, %v2080_v12  ;;  %v2101_v48 = vadd.f32 %v2100_v26, %v5308_v51  ;;  %v2122_v44 = vadd.f32 %v2121_v32, %v5310_v30 }
 0x2ea   : > { %v2142_v43 = vsel %vm1111_vm1, %v1953_v1, 0.0  ;;  %v2164_v22 = vadd.f32 %v2163_v13, %v5315_v41  ;;  %v1233_v16 = vadd.f32 %v1232_v4, %v1231_v38  ;;  %v1246_v59 = vadd.f32 %v5144_v9, %v1244_v29 }
 0x2eb   : > { %v1247_v55 = vsel %vm1111_vm1, %v5906_v50, 0.0  ;;  %v2143_v27 = vadd.f32 %v2142_v43, %v5313_v56  ;;  %v2083_v24 = vrot.slane %v2082_v23, 4  ;;  %v2103_v25 = vadd.f32 %v2102_v33, %v2101_v48 }
 0x2ec   : > { %v2124_v49 = vadd.f32 %v2123_v46, %v2122_v44  ;;  %v5907_v58 = vcombine.high %v5035_v52, %v5035_v52  ;;  %v1922_v51 = vcombine.high %v1920_v7, %v1920_v7  ;;  %v1194_v12 = vrot.slane %v1193_v61, 1 }
 0x2ed   : > { %v1248_v30 = vadd.f32 %v1247_v55, %v1246_v59  ;;  %v1263_v1 = vadd.f32 %v4972_v17, %v4836_v14  ;;  %v2084_v56 = vadd.f32 %v2083_v24, %v2082_v23  ;;  %v2104_v26 = vrot.slane %v2103_v25, 4 }
 0x2ee   : > { %v1249_v35 = vsel %vm1111_vm1, %v5907_v58, 0.0  ;;  %v5908_v41 = vcombine.high %v4884_v53, %v4884_v53  ;;  %v5909_v44 = vcombine.high %v4946_v2, %v4946_v2  ;;  %v2165_v4 = vsel %vm1111_vm1, %v5376_v34, 0.0 }
 0x2ef   : > { %v1215_v7 = vrot.slane %v1214_v54, 1  ;;  %v1250_v38 = vadd.f32 %v1249_v35, %v1248_v30  ;;  %v2105_v33 = vadd.f32 %v2104_v26, %v2103_v25  ;;  %v5425_v14 = vadd.f32 %v1173_v5, %v1172_v6 }
 0x2f0   : > { %v1264_v9 = vsel %vm1111_vm1, %v5908_v41, 0.0  ;;  %v1266_v52 = vsel %vm1111_vm1, %v5909_v44, 0.0  ;;  %v1234_v17 = vrot.slane %v1233_v16, 2  ;;  %v5910_v53 = vcombine.high %v5011_v37, %v5011_v37 }
 0x2f1   : > { %v1265_v29 = vadd.f32 %v1264_v9, %v1263_v1  ;;  %v2144_v46 = vsel %vm1111_vm1, %v2002_v3, 0.0  ;;  %v2085_v2 = vrot.slane %v2084_v56, 2  ;;  %v5433_v50 = vrot.slane %v1922_v51, %v4766_v31 }
 0x2f2   : > { %v1251_v23 = vsel %vm1111_vm1, %v5910_v53, 0.0  ;;  %v5435_v55 = vadd.f32 %v1194_v12, %v1193_v61  ;;  %v5911_v6 = vcombine.high %v4934_v42, %v4934_v42  ;;  %v5912_v37 = vcombine.high %v5166_v62, %v5166_v62 }
 0x2f3   : > { %v1252_v32 = vadd.f32 %v1251_v23, %v1250_v38  ;;  %v1267_v13 = vadd.f32 %v1266_v52, %v1265_v29  ;;  %v1952_v3 = vcombine.high %v5388_v36, %v5388_v36  ;;  %v5447_v43 = vadd.f32 %v1215_v7, %v1214_v54 }
 0x2f4   : > { %v1268_v5 = vsel %vm1111_vm1, %v5911_v6, 0.0  ;;  %v1270_v48 = vsel %vm1111_vm1, %v5912_v37, 0.0  ;;  %v2106_v24 = vrot.slane %v2105_v33, 2  ;;  %v5449_v25 = vadd.f32 %v1234_v17, %v1233_v16 }
 0x2f5   : > { %v1269_v59 = vadd.f32 %v1268_v5, %v1267_v13  ;;  %v5913_v61 = vcombine.high %v5323_v19, %v5323_v19  ;;  %v2125_v58 = vrot.slane %v2124_v49, 4  ;;  %v2145_v35 = vadd.f32 %v2144_v46, %v2143_v27 }
 0x2f6   : > { %v5914_v62 = vcombine.high %v5349_v45, %v5349_v45  ;;  %v2086_v54 = vadd.f32 %v2085_v2, %v2084_v56  ;;  %v2166_v36 = vadd.f32 %v2165_v4, %v2164_v22  ;;  %v1905_v16 = vcombine.high %v5267_v63, %v5267_v63 }
 0x2f7   : > { %v1272_v42 = vsel %vm1111_vm1, %v5913_v61, 0.0  ;;  %v1271_v51 = vadd.f32 %v1270_v48, %v1269_v59  ;;  %v2126_v30 = vadd.f32 %v2125_v58, %v2124_v49  ;;  %v2146_v1 = vrot.slane %v2145_v35, 4 }
 0x2f8   : > { %v5459_v12 = vrot.slane %v5914_v62, %v4766_v31  ;;  %v2183_v19 = vadd.f32 %v5286_v18, %v5304_v15  ;;  %v1954_v27 = vcombine.high %v5433_v50, %v5433_v50  ;;  %v2107_v41 = vadd.f32 %v2106_v24, %v2105_v33 }
 0x2f9   : > { %v1273_v26 = vadd.f32 %v1272_v42, %v1271_v51  ;;  %v2167_v9 = vrot.slane %v2166_v36, 4  ;;  %v2001_v45 = vcombine.high %v5376_v34, %v5376_v34  ;;  %v2127_v44 = vrot.slane %v2126_v30, 2 }
 0x2fa   : > { %v2147_v56 = vadd.f32 %v2146_v1, %v2145_v35  ;;  %v2184_v22 = vsel %vm1111_vm1, %v5433_v50, 0.0  ;;  %v1253_v63 = vrot.slane %v1252_v32, 4  ;;  %v2087_v49 = vrot.slane %v2086_v54, 1 }
 0x2fb   : > { %v2168_v52 = vadd.f32 %v2167_v9, %v2166_v36  ;;  %v2186_v18 = vsel %vm1111_vm1, %v5459_v12, 0.0  ;;  %v2128_v15 = vadd.f32 %v2127_v44, %v2126_v30  ;;  %v2185_v7 = vadd.f32 %v2184_v22, %v2183_v19 }
 0x2fc   : > { %v2148_v4 = vrot.slane %v2147_v56, 2  ;;  %v2200_v38 = vadd.f32 %v5259_v20, %v5228_v21  ;;  %v2003_v34 = vcombine.high %v5459_v12, %v5459_v12  ;;  %v2108_v29 = vrot.slane %v2107_v41, 1 }
 0x2fd   : > { %v2169_v33 = vrot.slane %v2168_v52, 2  ;;  %v5915_v17 = vcombine.high %v5256_v47, %v5256_v47  ;;  %v2129_v23 = vrot.slane %v2128_v15, 1  ;;  %v2187_v2 = vadd.f32 %v2186_v18, %v2185_v7 }
 0x2fe   : > { %v2149_v46 = vadd.f32 %v2148_v4, %v2147_v56  ;;  %v2202_v13 = vadd.f32 %v5362_v0, %v2200_v38  ;;  %v1254_v50 = vadd.f32 %v1253_v63, %v1252_v32  ;;  %v2088_v6 = vadd.f32 %v2087_v49, %v2086_v54 }
 0x2ff   : > { %v2203_v53 = vsel %vm1111_vm1, %v5915_v17, 0.0  ;;  %v2170_v5 = vadd.f32 %v2169_v33, %v2168_v52  ;;  %v2205_v21 = vsel %vm1111_vm1, %v1952_v3, 0.0  ;;  %v1274_v20 = vrot.slane %v1273_v26, 4 }
 0x300   : > { %v2150_v37 = vrot.slane %v2149_v46, 1  ;;  %v2188_v48 = vrot.slane %v2187_v2, 4  ;;  %v2204_v59 = vadd.f32 %v2203_v53, %v2202_v13  ;;  %v2109_v24 = vadd.f32 %v2108_v29, %v2107_v41 }
 0x301   : > { %v2171_v61 = vrot.slane %v2170_v5, 1  ;;  %v2207_v47 = vsel %vm1111_vm1, %v2001_v45, 0.0  ;;  %v2219_v42 = vadd.f32 %v5264_v8, %v5136_v60  ;;  %v2130_v58 = vadd.f32 %v2129_v23, %v2128_v15 }
 0x302   : > { %v2189_v35 = vadd.f32 %v2188_v48, %v2187_v2  ;;  %v2206_v51 = vadd.f32 %v2205_v21, %v2204_v59  ;;  %v5916_v0 = vcombine.high %v5190_v57, %v5190_v57  ;;  %v2151_v3 = vadd.f32 %v2150_v37, %v2149_v46 }
 0x303   : > { %v2172_v62 = vadd.f32 %v2171_v61, %v2170_v5  ;;  %v5917_v54 = vcombine.high %v5292_v28, %v5292_v28  ;;  %v1255_v30 = vrot.slane %v1254_v50, 2  ;;  %v2224_v60 = vsel %vm1111_vm1, %v1905_v16, 0.0 }
 0x304   : > { %v2220_v32 = vsel %vm1111_vm1, %v5916_v0, 0.0  ;;  %v2190_v1 = vrot.slane %v2189_v35, 2  ;;  %v2208_v19 = vadd.f32 %v2207_v47, %v2206_v51  ;;  %v1236_v8 = vrot.slane %v5449_v25, 1 }
 0x305   : > { %v2221_v12 = vadd.f32 %v2220_v32, %v2219_v42  ;;  %v2222_v36 = vsel %vm1111_vm1, %v5917_v54, 0.0  ;;  %v2226_v57 = vsel %vm1111_vm1, %v1954_v27, 0.0  ;;  %v5498_v9 = vadd.f32 %v2088_v6, %v5370_v10  ;;  %v5919_v32 = vld [vmem:[#allocation14_spill] sm:$0xff] }
 0x306   : > { %v2191_v45 = vadd.f32 %v2190_v1, %v2189_v35  ;;  %v2209_v44 = vrot.slane %v2208_v19, 4  ;;  %v5501_v56 = vadd.f32 %v2109_v24, %v5372_v11  ;;  %v5504_v28 = vadd.f32 %v2130_v58, %v5425_v14  ;;  %v5918_v58 = vld [vmem:[#allocation15_spill] sm:$0xff] }
 0x307   : > { %v2223_v41 = vadd.f32 %v2222_v36, %v2221_v12  ;;  %v1275_v22 = vadd.f32 %v1274_v20, %v1273_v26  ;;  %v5507_v16 = vadd.f32 %v2151_v3, %v5435_v55  ;;  %v5510_v49 = vadd.f32 %v2172_v62, %v5447_v43 }
 0x308   : > { %v1256_v27 = vadd.f32 %v1255_v30, %v1254_v50  ;;  %v2192_v52 = vrot.slane %v2191_v45, 1  ;;  %v2210_v10 = vadd.f32 %v2209_v44, %v2208_v19  ;;  %v2228_v18 = vsel %vm1111_vm1, %v2003_v34, 0.0  ;;  %v5920_v30 = vld [vmem:[#allocation17_spill] sm:$0xff] }
 0x309   : > { %v2225_v63 = vadd.f32 %v2224_v60, %v2223_v41  ;;  %v1237_v11 = vadd.f32 %v1236_v8, %v5449_v25  ;;  %v1276_v14 = vrot.slane %v1275_v22, 2  ;;  %v5921_v60 = vld [vmem:[#allocation16_spill] sm:$0xff] }
 0x30a   : > { %v2193_v4 = vadd.f32 %v2192_v52, %v2191_v45  ;;  %v2211_v7 = vrot.slane %v2210_v10, 2  ;;  %v1257_v26 = vrot.slane %v1256_v27, 1  ;;  %v5922_v45 = vld [vmem:[#allocation19_spill] sm:$0xff] }
 0x30b   : > { %v2227_v15 = vadd.f32 %v2226_v57, %v2225_v63  ;;  %v1277_v43 = vadd.f32 %v1276_v14, %v1275_v22 }
 0x30c   : > { %v2212_v29 = vadd.f32 %v2211_v7, %v2210_v10  ;;  %v5514_v33 = vadd.f32 %v2193_v4, %v1237_v11  ;;  %v1258_v23 = vadd.f32 %v1257_v26, %v1256_v27 }
 0x30d   : > { %v2229_v38 = vadd.f32 %v2228_v18, %v2227_v15  ;;  %v1278_v34 = vrot.slane %v1277_v43, 1 }
 0x30e   : > { %v2213_v17 = vrot.slane %v2212_v29, 1 }
 0x30f   : > { %v2230_v55 = vrot.slane %v2229_v38, 4  ;;  %v1279_v6 = vadd.f32 %v1278_v34, %v1277_v43 }
 0x310   : > { %v2214_v46 = vadd.f32 %v2213_v17, %v2212_v29 }
 0x311   : > { %v2231_v53 = vadd.f32 %v2230_v55, %v2229_v38 }
 0x312   : > { %v5516_v13 = vadd.f32 %v2214_v46, %v1258_v23  ;;  %v5923_v23 = vld [vmem:[#allocation18_spill] sm:$0xff] }
 0x313   : > { %v2232_v2 = vrot.slane %v2231_v53, 2 }
 0x315   : > { %v2233_v50 = vadd.f32 %v2232_v2, %v2231_v53 }
 0x317   : > { %v2234_v25 = vrot.slane %v2233_v50, 1 }
 0x319   : > { %v2235_v5 = vadd.f32 %v2234_v25, %v2233_v50 }
 0x31b   : > { %v5518_v21 = vadd.f32 %v2235_v5, %v1279_v6 }
 0x337   : > { %v3752_v20 = vpop.f32.mrb[16].mxu1 }
 0x338   : > { %v2481_v37 = vsub.f32 %v4684_v40, %v3752_v20  ;;  %v2441_v48 = vpop.f32.mrb[17].mxu1 }
 0x339   : > { %v2480_v59 = vsub.f32 %v4682_v39, %v2441_v48 }
 0x33a   : > { %v2489_v24 = vmul.f32 %v2481_v37, %v2481_v37 }
 0x33b   : > { %v2488_v61 = vmul.f32 %v2480_v59, %v2480_v59  ;;  %v3755_v47 = vpop.f32.mrb[18].mxu1 }
 0x33c   : > { %v2497_v42 = vadd.f32 1e-06, %v2489_v24  ;;  %v2483_v35 = vsub.f32 %v5918_v58, %v3755_v47  ;;  %v2451_v51 = vpop.f32.mrb[19].mxu1 }
 0x33d   : > { %v2496_v0 = vadd.f32 1e-06, %v2488_v61  ;;  %v2482_v3 = vsub.f32 %v5919_v32, %v2451_v51 }
 0x33e   : > { %4016 = vrsqrt.f32 %v2497_v42  ;;  %v2491_v12 = vmul.f32 %v2483_v35, %v2483_v35  ;;  %vm2513_vm4 = vcmp.eq.f32.partialorder %v2497_v42, inf  ;;  %vm2515_vm5 = vcmp.eq.f32.partialorder %v2497_v42, 0.0 }
 0x33f   : > { %4018 = vrsqrt.f32 %v2496_v0  ;;  %v3758_v62 = vpop.f32.mrb[20].mxu1  ;;  %v2490_v54 = vmul.f32 %v2482_v3, %v2482_v3  ;;  %v2516_v10 = vand.u32 2147483648, %v2497_v42  ;;  %vm2506_vm6 = vcmp.eq.f32.partialorder %v2496_v0, inf }
 0x340   : > { %v2461_v36 = vpop.f32.mrb[21].mxu1  ;;  %v5524_v40 = vadd.f32 1e-06, %v2491_v12  ;;  %v2485_v39 = vsub.f32 %v5920_v30, %v3758_v62  ;;  %vm2508_vm7 = vcmp.eq.f32.partialorder %v2496_v0, 0.0  ;;  %v2509_v7 = vand.u32 2147483648, %v2496_v0 }
 0x341   : > { %v5527_v1 = vadd.f32 1e-06, %v2490_v54  ;;  %v2484_v8 = vsub.f32 %v5921_v60, %v2461_v36 }
 0x342   : > { %4020 = vrsqrt.f32 %v5524_v40  ;;  %v2493_v57 = vmul.f32 %v2485_v39, %v2485_v39  ;;  %v2530_v14 = vand.u32 2147483648, %v5524_v40  ;;  %vm2527_vm8 = vcmp.eq.f32.partialorder %v5524_v40, inf }
 0x343   : > { %v3761_v19 = vpop.f32.mrb[22].mxu1  ;;  %4022 = vrsqrt.f32 %v5527_v1  ;;  %v2492_v63 = vmul.f32 %v2484_v8, %v2484_v8  ;;  %v2523_v29 = vand.u32 2147483648, %v5527_v1  ;;  %vm2529_vm9 = vcmp.eq.f32.partialorder %v5524_v40, 0.0 }
 0x344   : > { %v2471_v41 = vpop.f32.mrb[23].mxu1  ;;  %v2487_v44 = vsub.f32 %v5922_v45, %v3761_v19  ;;  %v5533_v15 = vadd.f32 1e-06, %v2493_v57  ;;  %vm2520_vm10 = vcmp.eq.f32.partialorder %v5527_v1, inf  ;;  %vm2522_vm11 = vcmp.eq.f32.partialorder %v5527_v1, 0.0 }
 0x345   : > { %v5537_v55 = vadd.f32 1e-06, %v2492_v63  ;;  %v5541_v46 = vsub.f32 %v5923_v23, %v2471_v41 }
 0x346   : > { %v2495_v11 = vmul.f32 %v2487_v44, %v2487_v44  ;;  %4024 = vrsqrt.f32 %v5533_v15  ;;  %v2544_v20 = vand.u32 2147483648, %v5533_v15  ;;  %vm2541_vm12 = vcmp.eq.f32.partialorder %v5533_v15, inf }
 0x347   : > { %4026 = vrsqrt.f32 %v5537_v55  ;;  %vm2543_vm13 = vcmp.eq.f32.partialorder %v5533_v15, 0.0  ;;  %vm2534_vm14 = vcmp.eq.f32.partialorder %v5537_v55, inf  ;;  %vm2536_vm15 = vcmp.eq.f32.partialorder %v5537_v55, 0.0 }
 0x348   : > { %v4017_v22 = vpop.eup %4016  ;;  %v5545_v50 = vadd.f32 1e-06, %v2495_v11 }
 0x349   : > { %v4019_v27 = vpop.eup %4018  ;;  %v2512_v52 = vmul.f32 %v4017_v22, %v2497_v42 }
 0x34a   : > { %v2505_v18 = vmul.f32 %v4019_v27, %v2496_v0  ;;  %4028 = vrsqrt.f32 %v5545_v50  ;;  %vm2555_vm0 = vcmp.eq.f32.partialorder %v5545_v50, inf  ;;  %vm2557_vm2 = vcmp.eq.f32.partialorder %v5545_v50, 0.0 }
 0x34b   : > { %v2514_v4 = vsel %vm2513_vm4, %v2497_v42, %v2512_v52 }
 0x34c   : > { %v2517_v38 = vsel %vm2515_vm5, %v2516_v10, %v2514_v4  ;;  %v2507_v26 = vsel %vm2506_vm6, %v2496_v0, %v2505_v18  ;;  %v4021_v37 = vpop.eup %4020  ;;  %vm3208_vm5 = vcmask 1041409   ;;  %vm3210_vm6 = vcmask 1042434  }
 0x34d   : > { %v2617_v17 = vcombine.high %v2517_v38, %v2517_v38  ;;  %v2624_v43 = vrot.slane %v2517_v38, %v4766_v31  ;;  %v2510_v53 = vsel %vm2508_vm7, %v2509_v7, %v2507_v26  ;;  %v4023_v61 = vpop.eup %4022  ;;  %v2526_v54 = vmul.f32 %v4021_v37, %v5524_v40 }
 0x34e   : > { %v2568_v2 = vcombine.high %v2510_v53, %v2510_v53  ;;  %v2575_v34 = vrot.slane %v2510_v53, %v4766_v31  ;;  %v2519_v19 = vmul.f32 %v4023_v61, %v5527_v1  ;;  %vm3214_vm7 = vcmask 1044484  }
 0x34f   : > { %v2631_v25 = vrot.slane %v2617_v17, %v4766_v31  ;;  %v2632_v6 = vcombine.high %v2624_v43, %v2624_v43  ;;  %v2640_v5 = vrot.slane %v2624_v43, %v4766_v31 }
 0x350   : > { %v2582_v48 = vrot.slane %v2568_v2, %v4766_v31  ;;  %v2583_v59 = vcombine.high %v2575_v34, %v2575_v34  ;;  %v2591_v24 = vrot.slane %v2575_v34, %v4766_v31  ;;  %v4025_v11 = vpop.eup %4024 }
 0x351   : > { %v2633_v47 = vcombine.high %v2631_v25, %v2631_v25  ;;  %v2647_v42 = vrot.slane %v2631_v25, %v4766_v31  ;;  %v2654_v58 = vrot.slane %v2632_v6, %v4766_v31  ;;  %v2662_v35 = vcombine.high %v2640_v5, %v2640_v5  ;;  %v4027_v2 = vpop.eup %4026 }
 0x352   : > { %v2584_v51 = vcombine.high %v2582_v48, %v2582_v48  ;;  %v2598_v0 = vrot.slane %v2582_v48, %v4766_v31  ;;  %v2605_v32 = vrot.slane %v2583_v59, %v4766_v31  ;;  %v3025_v36 = vsel %vm1111_vm1, %v2640_v5, 0.0 }
 0x353   : > { %v5562_v3 = vrot.slane %v2633_v47, %v4766_v31  ;;  %v2663_v62 = vcombine.high %v2647_v42, %v2647_v42  ;;  %v2664_v12 = vcombine.high %v2654_v58, %v2654_v58  ;;  %v3046_v30 = vsel %vm1111_vm1, %v2654_v58, 0.0 }
 0x354   : > { %v2613_v39 = vcombine.high %v2591_v24, %v2591_v24  ;;  %v3067_v60 = vsel %vm1111_vm1, %v2662_v35, 0.0  ;;  %v3109_v41 = vsel %vm1111_vm1, %v2647_v42, 0.0  ;;  %v2612_v57 = vrot.slane %v2584_v51, %v4766_v31  ;;  %v4029_v61 = vpop.eup %4028 }
 0x355   : > { %v3088_v8 = vsel %vm1111_vm1, %v2664_v12, 0.0  ;;  %v3130_v45 = vsel %vm1111_vm1, %v5562_v3, 0.0  ;;  %v2614_v44 = vcombine.high %v2598_v0, %v2598_v0  ;;  %v2615_v22 = vcombine.high %v2605_v32, %v2605_v32 }
 0x356   : > { %v3024_v63 = vsel %vm1111_vm1, %v2591_v24, 0.0  ;;  %v3151_v27 = vsel %vm1111_vm1, %v2663_v62, 0.0  ;;  %v3045_v10 = vsel %vm1111_vm1, %v2605_v32, 0.0  ;;  %v3066_v18 = vsel %vm1111_vm1, %v2613_v39, 0.0 }
 0x357   : > { %v5578_v52 = vadd.f32 %v3025_v36, %v3024_v63  ;;  %v5583_v4 = vadd.f32 %v3046_v30, %v3045_v10  ;;  %v5585_v7 = vadd.f32 %v3067_v60, %v3066_v18  ;;  %v3087_v38 = vsel %vm1111_vm1, %v2615_v22, 0.0 }
 0x358   : > { %v3108_v26 = vsel %vm1111_vm1, %v2598_v0, 0.0  ;;  %v5589_v17 = vadd.f32 %v3088_v8, %v3087_v38  ;;  %v3129_v53 = vsel %vm1111_vm1, %v2612_v57, 0.0  ;;  %v3150_v23 = vsel %vm1111_vm1, %v2614_v44, 0.0 }
 0x359   : > { %v3110_v43 = vadd.f32 %v3109_v41, %v3108_v26  ;;  %v3131_v34 = vadd.f32 %v3130_v45, %v3129_v53  ;;  %v3152_v25 = vadd.f32 %v3151_v27, %v3150_v23  ;;  %v2528_v6 = vsel %vm2527_vm8, %v5524_v40, %v2526_v54 }
 0x35a   : > { %v2537_v5 = vand.u32 2147483648, %v5537_v55  ;;  %v2531_v37 = vsel %vm2529_vm9, %v2530_v14, %v2528_v6  ;;  %v2521_v48 = vsel %vm2520_vm10, %v5527_v1, %v2519_v19  ;;  %v2540_v59 = vmul.f32 %v4025_v11, %v5533_v15 }
 0x35b   : > { %v2494_v24 = vmul.f32 %v5541_v46, %v5541_v46  ;;  %v2665_v47 = vcombine.high %v5562_v3, %v5562_v3  ;;  %v2715_v42 = vcombine.high %v2531_v37, %v2531_v37  ;;  %v2722_v58 = vrot.slane %v2531_v37, %v4766_v31 }
 0x35c   : > { %v2524_v40 = vsel %vm2522_vm11, %v2523_v29, %v2521_v48  ;;  %v2616_v14 = vcombine.high %v2612_v57, %v2612_v57  ;;  %v2542_v46 = vsel %vm2541_vm12, %v5533_v15, %v2540_v59  ;;  %v2533_v62 = vmul.f32 %v4027_v2, %v5537_v55 }
 0x35d   : > { %v2666_v35 = vcombine.high %v2524_v40, %v2524_v40  ;;  %v2673_v51 = vrot.slane %v2524_v40, %v4766_v31  ;;  %v2729_v0 = vrot.slane %v2715_v42, %v4766_v31  ;;  %v2730_v32 = vcombine.high %v2722_v58, %v2722_v58 }
 0x35e   : > { %v2738_v3 = vrot.slane %v2722_v58, %v4766_v31  ;;  %v5624_v29 = vadd.f32 1e-06, %v2494_v24  ;;  %v2545_v19 = vsel %vm2543_vm13, %v2544_v20, %v2542_v46  ;;  %v5636_v45 = vsel %vm1111_vm1, %v2665_v47, 0.0 }
 0x35f   : > { %v2680_v12 = vrot.slane %v2666_v35, %v4766_v31  ;;  %v2681_v54 = vcombine.high %v2673_v51, %v2673_v51  ;;  %v2689_v1 = vrot.slane %v2673_v51, %v4766_v31  ;;  %v2731_v36 = vcombine.high %v2729_v0, %v2729_v0 }
 0x360   : > { %v2745_v30 = vrot.slane %v2729_v0, %v4766_v31  ;;  %v2752_v39 = vrot.slane %v2730_v32, %v4766_v31  ;;  %v2760_v60 = vcombine.high %v2738_v3, %v2738_v3  ;;  %v5639_v44 = vsel %vm1111_vm1, %v2616_v14, 0.0 }
 0x361   : > { %v2682_v8 = vcombine.high %v2680_v12, %v2680_v12  ;;  %v2696_v41 = vrot.slane %v2680_v12, %v4766_v31  ;;  %v2703_v57 = vrot.slane %v2681_v54, %v4766_v31  ;;  %v2535_v22 = vsel %vm2534_vm14, %v5537_v55, %v2533_v62 }
 0x362   : > { %v5645_v15 = vmul.f32 %v4029_v61, %v5545_v50  ;;  %v5648_v20 = vrot.slane %v2731_v36, %v4766_v31  ;;  %v3029_v63 = vsel %vm1111_vm1, %v2738_v3, 0.0  ;;  %v2711_v27 = vcombine.high %v2689_v1, %v2689_v1 }
 0x363   : > { %v2813_v10 = vcombine.high %v2545_v19, %v2545_v19  ;;  %v2761_v18 = vcombine.high %v2745_v30, %v2745_v30  ;;  %v2762_v11 = vcombine.high %v2752_v39, %v2752_v39  ;;  %v3050_v38 = vsel %vm1111_vm1, %v2752_v39, 0.0 }
 0x364   : > { %v5653_v26 = vrot.slane %v2682_v8, %v4766_v31  ;;  %v3071_v53 = vsel %vm1111_vm1, %v2760_v60, 0.0  ;;  %v2712_v23 = vcombine.high %v2696_v41, %v2696_v41  ;;  %v2713_v2 = vcombine.high %v2703_v57, %v2703_v57 }
 0x365   : > { %v3027_v6 = vsel %vm1111_vm1, %v2689_v1, 0.0  ;;  %v3048_v48 = vsel %vm1111_vm1, %v2703_v57, 0.0  ;;  %v3069_v59 = vsel %vm1111_vm1, %v2711_v27, 0.0  ;;  %v3111_v24 = vsel %vm1111_vm1, %v2696_v41, 0.0 }
 0x366   : > { %v3028_v37 = vadd.f32 %v3027_v6, %v5578_v52  ;;  %v3049_v61 = vadd.f32 %v3048_v48, %v5583_v4  ;;  %v3070_v47 = vadd.f32 %v3069_v59, %v5585_v7  ;;  %v3090_v42 = vsel %vm1111_vm1, %v2713_v2, 0.0 }
 0x367   : > { %v3112_v58 = vadd.f32 %v3111_v24, %v3110_v43  ;;  %v3091_v40 = vadd.f32 %v3090_v42, %v5589_v17  ;;  %v3132_v14 = vsel %vm1111_vm1, %v5653_v26, 0.0  ;;  %v3153_v52 = vsel %vm1111_vm1, %v2712_v23, 0.0 }
 0x368   : > { %v2820_v35 = vrot.slane %v2545_v19, %v4766_v31  ;;  %v5669_v51 = vadd.f32 %v3132_v14, %v3131_v34  ;;  %v5671_v46 = vadd.f32 %v3153_v52, %v3152_v25  ;;  %v2827_v4 = vrot.slane %v2813_v10, %v4766_v31 }
 0x369   : > { %v2538_v7 = vsel %vm2536_vm15, %v2537_v5, %v2535_v22  ;;  %v3113_v3 = vsel %vm1111_vm1, %v2745_v30, 0.0  ;;  %v3030_v34 = vadd.f32 %v3029_v63, %v3028_v37  ;;  %v3051_v12 = vadd.f32 %v3050_v38, %v3049_v61 }
 0x36a   : > { %v2828_v43 = vcombine.high %v2820_v35, %v2820_v35  ;;  %v2836_v17 = vrot.slane %v2820_v35, %v4766_v31  ;;  %v2764_v0 = vcombine.high %v2538_v7, %v2538_v7  ;;  %v2771_v32 = vrot.slane %v2538_v7, %v4766_v31 }
 0x36b   : > { %v2829_v62 = vcombine.high %v2827_v4, %v2827_v4  ;;  %v3092_v25 = vsel %vm1111_vm1, %v2762_v11, 0.0  ;;  %v5684_v54 = vrot.slane %v2827_v4, %v4766_v31  ;;  %v3134_v1 = vsel %vm1111_vm1, %v5648_v20, 0.0 }
 0x36c   : > { %v2850_v55 = vrot.slane %v2828_v43, %v4766_v31  ;;  %v2778_v5 = vrot.slane %v2764_v0, %v4766_v31  ;;  %v3155_v36 = vsel %vm1111_vm1, %v2761_v18, 0.0  ;;  %v2714_v30 = vcombine.high %v5653_v26, %v5653_v26 }
 0x36d   : > { %v2779_v39 = vcombine.high %v2771_v32, %v2771_v32  ;;  %v5694_v19 = vrot.slane %v2829_v62, %v4766_v31  ;;  %v2858_v60 = vcombine.high %v2836_v17, %v2836_v17  ;;  %v3033_v8 = vsel %vm1111_vm1, %v2836_v17, 0.0 }
 0x36e   : > { %v2780_v41 = vcombine.high %v2778_v5, %v2778_v5  ;;  %v2787_v57 = vrot.slane %v2771_v32, %v4766_v31  ;;  %v2794_v22 = vrot.slane %v2778_v5, %v4766_v31  ;;  %v3072_v27 = vadd.f32 %v3071_v53, %v3070_v47 }
 0x36f   : > { %v2801_v63 = vrot.slane %v2779_v39, %v4766_v31  ;;  %v2859_v10 = vcombine.high %v5684_v54, %v5684_v54  ;;  %v2860_v18 = vcombine.high %v2850_v55, %v2850_v55  ;;  %v3093_v11 = vadd.f32 %v3092_v25, %v3091_v40 }
 0x370   : > { %v3114_v38 = vadd.f32 %v3113_v3, %v3112_v58  ;;  %v3054_v26 = vsel %vm1111_vm1, %v2850_v55, 0.0  ;;  %v2809_v23 = vcombine.high %v2787_v57, %v2787_v57  ;;  %v3031_v6 = vsel %vm1111_vm1, %v2787_v57, 0.0 }
 0x371   : > { %v2811_v2 = vcombine.high %v2801_v63, %v2801_v63  ;;  %v2808_v37 = vrot.slane %v2780_v41, %v4766_v31  ;;  %v3032_v48 = vadd.f32 %v3031_v6, %v3030_v34  ;;  %v3052_v59 = vsel %vm1111_vm1, %v2801_v63, 0.0 }
 0x372   : > { %v3115_v24 = vsel %vm1111_vm1, %v2794_v22, 0.0  ;;  %v3053_v53 = vadd.f32 %v3052_v59, %v3051_v12  ;;  %v3073_v61 = vsel %vm1111_vm1, %v2809_v23, 0.0  ;;  %v3075_v58 = vsel %vm1111_vm1, %v2858_v60, 0.0 }
 0x373   : > { %v3094_v47 = vsel %vm1111_vm1, %v2811_v2, 0.0  ;;  %v3116_v42 = vadd.f32 %v3115_v24, %v3114_v38  ;;  %v3074_v40 = vadd.f32 %v3073_v61, %v3072_v27  ;;  %v2556_v52 = vsel %vm2555_vm0, %v5545_v50, %v5645_v15 }
 0x374   : > { %v3095_v14 = vadd.f32 %v3094_v47, %v3093_v11  ;;  %v3096_v35 = vsel %vm1111_vm1, %v2860_v18, 0.0  ;;  %v2810_v4 = vcombine.high %v2794_v22, %v2794_v22  ;;  %v2558_v7 = vand.u32 2147483648, %v5545_v50 }
 0x375   : > { %4030 = vrsqrt.f32 %v5624_v29  ;;  %v5718_v43 = vadd.f32 %v3033_v8, %v3032_v48  ;;  %v5720_v17 = vadd.f32 %v3054_v26, %v3053_v53  ;;  %v5722_v0 = vadd.f32 %v3075_v58, %v3074_v40 }
 0x376   : > { %v3117_v32 = vsel %vm1111_vm1, %v5684_v54, 0.0  ;;  %v3136_v15 = vsel %vm1111_vm1, %v2808_v37, 0.0  ;;  %v2559_v3 = vsel %vm2557_vm2, %v2558_v7, %v2556_v52  ;;  %v5727_v62 = vadd.f32 %v3096_v35, %v3095_v14 }
 0x377   : > { %v2911_v34 = vcombine.high %v2559_v3, %v2559_v3  ;;  %v2918_v12 = vrot.slane %v2559_v3, %v4766_v31  ;;  %v5730_v25 = vadd.f32 %v3117_v32, %v3116_v42  ;;  %v3135_v50 = vadd.f32 %v3134_v1, %v5669_v51 }
 0x378   : > { %v3156_v55 = vadd.f32 %v3155_v36, %v5671_v46  ;;  %v3157_v5 = vsel %vm1111_vm1, %v2810_v4, 0.0  ;;  %v2763_v39 = vcombine.high %v5648_v20, %v5648_v20  ;;  %v2812_v60 = vcombine.high %v2808_v37, %v2808_v37 }
 0x379   : > { %v2925_v54 = vrot.slane %v2911_v34, %v4766_v31  ;;  %v3137_v8 = vadd.f32 %v3136_v15, %v3135_v50  ;;  %v2926_v41 = vcombine.high %v2918_v12, %v2918_v12  ;;  %v3173_v22 = vadd.f32 %v5636_v45, %v5639_v44 }
 0x37a   : > { %v3158_v57 = vadd.f32 %v3157_v5, %v3156_v55  ;;  %v3174_v63 = vsel %vm1111_vm1, %v2714_v30, 0.0  ;;  %v3138_v51 = vsel %vm1111_vm1, %v5694_v19, 0.0  ;;  %v3159_v46 = vsel %vm1111_vm1, %v2859_v10, 0.0 }
 0x37b   : > { %v2927_v1 = vcombine.high %v2925_v54, %v2925_v54  ;;  %v5744_v36 = vadd.f32 %v3138_v51, %v3137_v8  ;;  %v3175_v27 = vadd.f32 %v3174_v63, %v3173_v22  ;;  %v2861_v18 = vcombine.high %v5694_v19, %v5694_v19 }
 0x37c   : > { %v5746_v20 = vadd.f32 %v3159_v46, %v3158_v57  ;;  %v3176_v11 = vsel %vm1111_vm1, %v2763_v39, 0.0  ;;  %v2934_v45 = vrot.slane %v2918_v12, %v4766_v31  ;;  %v2948_v44 = vrot.slane %v2926_v41, %v4766_v31 }
 0x37d   : > { %v3177_v30 = vadd.f32 %v3176_v11, %v3175_v27  ;;  %v3178_v26 = vsel %vm1111_vm1, %v2812_v60, 0.0  ;;  %vm2548_vm3 = vcmp.eq.f32.partialorder %v5624_v29, inf  ;;  %v2941_v23 = vrot.slane %v2925_v54, %v4766_v31 }
 0x37e   : > { %v2551_v2 = vand.u32 2147483648, %v5624_v29  ;;  %v2955_v19 = vrot.slane %v2927_v1, %v4766_v31  ;;  %vm2550_vm4 = vcmp.eq.f32.partialorder %v5624_v29, 0.0  ;;  %v3180_v48 = vsel %vm1111_vm1, %v2861_v18, 0.0 }
 0x37f   : > { %v4031_v38 = vpop.eup %4030  ;;  %v3179_v6 = vadd.f32 %v3178_v26, %v3177_v30  ;;  %v2956_v59 = vcombine.high %v2934_v45, %v2934_v45  ;;  %v2958_v24 = vcombine.high %v2948_v44, %v2948_v44  ;;  %v2957_v58 = vcombine.high %v2941_v23, %v2941_v23 }
 0x380   : > { %v2547_v10 = vmul.f32 %v4031_v38, %v5624_v29  ;;  %v2959_v40 = vcombine.high %v2955_v19, %v2955_v19  ;;  %v3037_v14 = vsel %vm1111_vm1, %v2934_v45, 0.0  ;;  %v3121_v15 = vsel %vm1111_vm1, %v2941_v23, 0.0 }
 0x381   : > { %v3181_v61 = vadd.f32 %v3180_v48, %v3179_v6  ;;  %v3079_v7 = vsel %vm1111_vm1, %v2956_v59, 0.0  ;;  %v3100_v32 = vsel %vm1111_vm1, %v2958_v24, 0.0  ;;  %v3142_v5 = vsel %vm1111_vm1, %v2955_v19, 0.0 }
 0x382   : > { %v2549_v37 = vsel %vm2548_vm3, %v5624_v29, %v2547_v10  ;;  %v3058_v29 = vsel %vm1111_vm1, %v2948_v44, 0.0  ;;  %v3163_v39 = vsel %vm1111_vm1, %v2957_v58, 0.0  ;;  %v3184_v54 = vsel %vm1111_vm1, %v2959_v40, 0.0 }
 0x383   : > { %v2552_v53 = vsel %vm2550_vm4, %v2551_v2, %v2549_v37  ;;  %vm3216_vm8 = vcmask 1045509   ;;  %vm3218_vm9 = vcmask 1046534   ;;  %vm3220_vm10 = vcmask 1047559  }
 0x384   : > { %v2862_v47 = vcombine.high %v2552_v53, %v2552_v53  ;;  %v2869_v42 = vrot.slane %v2552_v53, %v4766_v31 }
 0x386   : > { %v2876_v52 = vrot.slane %v2862_v47, %v4766_v31  ;;  %v2877_v35 = vcombine.high %v2869_v42, %v2869_v42  ;;  %v2885_v4 = vrot.slane %v2869_v42, %v4766_v31 }
 0x388   : > { %v2878_v3 = vcombine.high %v2876_v52, %v2876_v52  ;;  %v2892_v34 = vrot.slane %v2876_v52, %v4766_v31  ;;  %v2899_v12 = vrot.slane %v2877_v35, %v4766_v31  ;;  %v2907_v50 = vcombine.high %v2885_v4, %v2885_v4 }
 0x389   : > { %v3035_v55 = vsel %vm1111_vm1, %v2885_v4, 0.0 }
 0x38a   : > { %v2909_v60 = vcombine.high %v2899_v12, %v2899_v12  ;;  %v3036_v8 = vadd.f32 %v3035_v55, %v5718_v43  ;;  %v3056_v41 = vsel %vm1111_vm1, %v2899_v12, 0.0  ;;  %v3077_v57 = vsel %vm1111_vm1, %v2907_v50, 0.0 }
 0x38b   : > { %v3057_v22 = vadd.f32 %v3056_v41, %v5720_v17  ;;  %v3078_v63 = vadd.f32 %v3077_v57, %v5722_v0  ;;  %v3119_v51 = vsel %vm1111_vm1, %v2892_v34, 0.0  ;;  %v2906_v46 = vrot.slane %v2878_v3, %v4766_v31 }
 0x38c   : > { %v3038_v1 = vadd.f32 %v3037_v14, %v3036_v8  ;;  %v3098_v27 = vsel %vm1111_vm1, %v2909_v60, 0.0  ;;  %v2908_v18 = vcombine.high %v2892_v34, %v2892_v34  ;;  %v3120_v11 = vadd.f32 %v3119_v51, %v5730_v25 }
 0x38d   : > { %v3059_v38 = vadd.f32 %v3058_v29, %v3057_v22  ;;  %v2910_v43 = vcombine.high %v2906_v46, %v2906_v46  ;;  %v3080_v45 = vadd.f32 %v3079_v7, %v3078_v63  ;;  %v3099_v44 = vadd.f32 %v3098_v27, %v5727_v62 }
 0x38e   : > { %v3039_v30 = vrot.slane %v3038_v1, 4  ;;  %v3122_v26 = vadd.f32 %v3121_v15, %v3120_v11  ;;  %v3140_v17 = vsel %vm1111_vm1, %v2906_v46, 0.0  ;;  %v3161_v0 = vsel %vm1111_vm1, %v2908_v18, 0.0 }
 0x38f   : > { %v3060_v10 = vrot.slane %v3059_v38, 4  ;;  %v3081_v23 = vrot.slane %v3080_v45, 4  ;;  %v3101_v31 = vadd.f32 %v3100_v32, %v3099_v44  ;;  %v3141_v2 = vadd.f32 %v3140_v17, %v5744_v36 }
 0x390   : > { %v3040_v19 = vadd.f32 %v3039_v30, %v3038_v1  ;;  %v3123_v6 = vrot.slane %v3122_v26, 4  ;;  %v3162_v25 = vadd.f32 %v3161_v0, %v5746_v20  ;;  %v3182_v37 = vsel %vm1111_vm1, %v2910_v43, 0.0 }
 0x391   : > { %v3061_v48 = vadd.f32 %v3060_v10, %v3059_v38  ;;  %v3082_v59 = vadd.f32 %v3081_v23, %v3080_v45  ;;  %v3102_v62 = vrot.slane %v3101_v31, 4  ;;  %v3143_v24 = vadd.f32 %v3142_v5, %v3141_v2 }
 0x392   : > { %v3041_v53 = vrot.slane %v3040_v19, 2  ;;  %v3124_v47 = vadd.f32 %v3123_v6, %v3122_v26  ;;  %v3164_v42 = vadd.f32 %v3163_v39, %v3162_v25  ;;  %v3183_v58 = vadd.f32 %v3182_v37, %v3181_v61 }
 0x393   : > { %v3062_v40 = vrot.slane %v3061_v48, 2  ;;  %v3083_v14 = vrot.slane %v3082_v59, 2  ;;  %v3103_v52 = vadd.f32 %v3102_v62, %v3101_v31  ;;  %v3144_v35 = vrot.slane %v3143_v24, 4 }
 0x394   : > { %v3042_v36 = vadd.f32 %v3041_v53, %v3040_v19  ;;  %v3125_v4 = vrot.slane %v3124_v47, 2  ;;  %v3165_v29 = vrot.slane %v3164_v42, 4  ;;  %v3185_v20 = vadd.f32 %v3184_v54, %v3183_v58 }
 0x395   : > { %v3063_v7 = vadd.f32 %v3062_v40, %v3061_v48  ;;  %v3084_v32 = vadd.f32 %v3083_v14, %v3082_v59  ;;  %v3104_v15 = vrot.slane %v3103_v52, 2  ;;  %v3145_v3 = vadd.f32 %v3144_v35, %v3143_v24 }
 0x396   : > { %v3043_v34 = vrot.slane %v3042_v36, 1  ;;  %v3126_v12 = vadd.f32 %v3125_v4, %v3124_v47  ;;  %v3166_v50 = vadd.f32 %v3165_v29, %v3164_v42  ;;  %v3186_v55 = vrot.slane %v3185_v20, 4 }
 0x397   : > { %v3064_v61 = vrot.slane %v3063_v7, 1  ;;  %v3085_v5 = vrot.slane %v3084_v32, 1  ;;  %v3105_v39 = vadd.f32 %v3104_v15, %v3103_v52  ;;  %v3146_v60 = vrot.slane %v3145_v3, 2 }
 0x398   : > { %v3044_v8 = vadd.f32 %v3043_v34, %v3042_v36  ;;  %v3127_v41 = vrot.slane %v3126_v12, 1  ;;  %v3167_v57 = vrot.slane %v3166_v50, 2  ;;  %v3187_v22 = vadd.f32 %v3186_v55, %v3185_v20 }
 0x399   : > { %v3065_v63 = vadd.f32 %v3064_v61, %v3063_v7  ;;  %v3086_v51 = vadd.f32 %v3085_v5, %v3084_v32  ;;  %v3106_v54 = vrot.slane %v3105_v39, 1  ;;  %v3147_v46 = vadd.f32 %v3146_v60, %v3145_v3 }
 0x39a   : > { %v3128_v1 = vadd.f32 %v3127_v41, %v3126_v12  ;;  %v3168_v27 = vadd.f32 %v3167_v57, %v3166_v50  ;;  %v3188_v18 = vrot.slane %v3187_v22, 2  ;;  %v3192_v11 = vadd.f32 %v3044_v8, %v5498_v9 }
 0x39b   : > { %v3107_v38 = vadd.f32 %v3106_v54, %v3105_v39  ;;  %v3148_v43 = vrot.slane %v3147_v46, 1  ;;  %v3193_v45 = vadd.f32 %v3065_v63, %v5501_v56  ;;  %v3194_v44 = vadd.f32 %v3086_v51, %v5504_v28 }
 0x39c   : > { %v3169_v30 = vrot.slane %v3168_v27, 1  ;;  %v3189_v26 = vadd.f32 %v3188_v18, %v3187_v22  ;;  %v3196_v17 = vadd.f32 %v3128_v1, %v5510_v49  ;;  %vm3212_vm1 = vcmask 1043459  }
 0x39d   : > { %v3149_v0 = vadd.f32 %v3148_v43, %v3147_v46  ;;  %v3195_v10 = vadd.f32 %v3107_v38, %v5507_v16  ;;  %v3209_v23 = vsel %vm3208_vm5, %v3193_v45, %v3192_v11 }
 0x39e   : > { %v3170_v31 = vadd.f32 %v3169_v30, %v3168_v27  ;;  %v3190_v9 = vrot.slane %v3189_v26, 1  ;;  %v3211_v2 = vsel %vm3210_vm6, %v3194_v44, %v3209_v23 }
 0x39f   : > { %v3197_v56 = vadd.f32 %v3149_v0, %v5514_v33  ;;  %v3213_v28 = vsel %vm3212_vm1, %v3195_v10, %v3211_v2 }
 0x3a0   : > { %v3191_v19 = vadd.f32 %v3190_v9, %v3189_v26  ;;  %v3198_v49 = vadd.f32 %v3170_v31, %v5516_v13  ;;  %v3215_v6 = vsel %vm3214_vm7, %v3196_v17, %v3213_v28 }
 0x3a1   : > { %v3217_v16 = vsel %vm3216_vm8, %v3197_v56, %v3215_v6 }
 0x3a2   : > { %v3199_v25 = vadd.f32 %v3191_v19, %v5518_v21  ;;  %v3219_v37 = vsel %vm3218_vm9, %v3198_v49, %v3217_v16 }
 0x3a4   : > { %v3221_v33 = vsel %vm3220_vm10, %v3199_v25, %v3219_v37 }
 0x3a5   : > { %3223 = vst [vmem:[%s281_s22] sm:$0xff] %v3221_v33 }
 0x3a6   : > { %4161 = shalt.err (!%p4158_p11)
}
 0x3a7   : > { %s4162_s6 = scalar_lea.hbm %s5806_s30, 128  ;;  %s4166_s29 = scalar_lea.hbm %s5854_s4, 256 }
 0x3a8   : > { %p4163_p12 = scmp.ne.s32.totalorder %s5806_s30, %s4162_s6  ;;  %p4167_p3 = scmp.lt.u32.totalorder %s5806_s30, %s5854_s4 }
 0x3a9   : > { %p4168_p7 = scmp.lt.u32.totalorder %s4166_s29, %s4162_s6  ;;  %p4170_p9 = scmp.lt.u32.totalorder %s4162_s6, %s5806_s30 }
 0x3aa   : > { %p4164_p2 = pnand %p4163_p12, %p5924_p8 }
 0x3ab   : > { %p4169_p5 = por %p4168_p7, %p4167_p3 }
 0x3ac   : > { %p4165_p13 = pneg %p4164_p2 }
 0x3ad   : > { %p4171_p0 = por %p4170_p9, %p4169_p5 }
 0x3af   : > { %p4172_p10 = pnand %p4171_p0, %p4165_p13 }
 0x3b1   : > { %4175 = shalt.err (!%p4172_p10)
}
 0x3b2   : > { %3921 = dma.vmem_to_hbm [thread:$0]  (%p5924_p8), %s5808_s14, 128, %s5806_s30, %s3225_s19  }
 0x3b3 PF: > { %s3250_s20 = sand.u32 1, %s4210_s15   ;;  %p5925_p1 = scmp.ne.s32.totalorder %s5873_s28, 0 }
 0x3b4   : > { %p5926_p4 = scmp.ge.s32.totalorder %s4222_s18, 2  ;;  %s3251_s26 = scalar_lea.sflag [#allocation4], %s3250_s20 }
 0x3b6   : > { %p3938_p6 = pnand %p5926_p4, %p5925_p1 }
 0x3b8   : > { %4205 = dma.done.wait (!%p3938_p6), %s3251_s26, 128  }
 0x3b9   : > { %4207 = vsyncadd (!%p3938_p6), %s3251_s26, 4294967168  ;;  %p16_p11 = scmp.ge.s32.totalorder %s4282_s21, 4   ;;  %s5927_s15 = smov %s4214_s16 }
 0x3ba   : > { %s5928_s16 = smov %s4218_s17  ;;  %s5929_s17 = smov %s4294_s24 }
 0x3bb   : > { %s5930_s18 = smov %s4282_s21  ;;  %18 = sbr.rel (!%p16_p11) target bundleno = 7 (0x7), region = 103 }
 0x3c2   :  { %3256 = vsyncpa [#allocation3], 1 }
 0x3c3   :  { %3258 = vsyncpa [#allocation3 + $0x1], 1 }
 0x3c4   :  { %3259 = vsyncpa [#allocation6], 1 }
 0x3c5   :  { %3260 = vsyncpa [#allocation4], 1 }
 0x3c6   :  { %3262 = vsyncpa [#allocation4 + $0x1], 1 }

</bundles_post_ra>
